<compile_context>
chip_gen: v7x
topology: tpu7x:2x2x1
jax: 0.10.0
libtpu: 0.0.40
codegen_flags: <defaults>
</compile_context>

<pallas_src>
import functools

import jax
import jax.numpy as jnp
from jax.experimental import pallas as pl
from jax.experimental.pallas import tpu as pltpu


# ---------------------------------------------------------------------------
# Fused kernel: one grid step == one group of GB graphs (GB*NP node rows).
#   input_message = node_feat @ W_n2l + b_n2l
#   cur           = relu(input_message)
#   repeat max_lv: cur = relu((n2n_blockdiag @ cur) @ W_conv + b_conv + input_message)
#   out           = relu(cur @ W_out + b_out)
#   embed         = pool_mask @ out            # per-graph masked sum pooling
#   h1            = relu(embed @ W1 + b1)
#   logits        = h1 @ W2 + b2               # W2/b2 lane-padded to 128
#   logp          = log_softmax(logits)
# ---------------------------------------------------------------------------
def classifier_kernel(node_feat_ref, n2n_ref, pool_ref,
                      w_n2l_ref, b_n2l_ref,
                      w_conv_ref, b_conv_ref,
                      w_out_ref, b_out_ref,
                      w1_ref, b1_ref, w2_ref, b2_ref,
                      logp_ref, *, max_lv):
    # Hoisted loads (JAX does not CSE these inside the unrolled loop).
    node_feat = node_feat_ref[...]        # (GB*NP, F)        f32
    n2n = n2n_ref[...]                    # (GB*NP, GB*NP)    bf16 (0/1 exact)
    pool = pool_ref[...]                  # (GB, GB*NP)       f32  (0/1 mask)
    w_n2l = w_n2l_ref[...]                # f32 (tiny K)
    b_n2l = b_n2l_ref[...]                # f32
    w_conv = w_conv_ref[...]              # bf16
    b_conv = b_conv_ref[...]              # f32
    w_out = w_out_ref[...]                # bf16
    b_out = b_out_ref[...]                # f32
    w1 = w1_ref[...]                      # bf16
    b1 = b1_ref[...]                      # f32
    w2 = w2_ref[...]                      # bf16
    b2 = b2_ref[...]                      # f32 (pad lanes = -1e9)

    # ---- EmbedMeanField over the whole group (block-diagonal n2n) ----
    input_msg = jnp.dot(node_feat, w_n2l,
                        preferred_element_type=jnp.float32) + b_n2l
    cur = jnp.maximum(input_msg, 0.0)     # element-wise work stays f32

    # max_lv is small & static -> unrolled python loop
    for _ in range(max_lv):
        pooled = jnp.dot(n2n, cur.astype(jnp.bfloat16),
                         preferred_element_type=jnp.float32)
        lin = jnp.dot(pooled.astype(jnp.bfloat16), w_conv,
                      preferred_element_type=jnp.float32) + b_conv
        cur = jnp.maximum(lin + input_msg, 0.0)

    out_act = jnp.maximum(
        jnp.dot(cur.astype(jnp.bfloat16), w_out,
                preferred_element_type=jnp.float32) + b_out, 0.0)

    # Per-graph sum pooling over real (non-padded) nodes: 0/1 mask matmul.
    # Reference applies relu(pool @ out_act); out_act >= 0 and pool is 0/1,
    # so that relu is a no-op and is dropped.
    embed = jnp.dot(pool, out_act, preferred_element_type=jnp.float32)  # (GB, D)

    # ---- MLPClassifier head, batched over the GB graphs of this group ----
    h1 = jnp.maximum(
        jnp.dot(embed.astype(jnp.bfloat16), w1,
                preferred_element_type=jnp.float32) + b1, 0.0)
    logits = jnp.dot(h1.astype(jnp.bfloat16), w2,
                     preferred_element_type=jnp.float32) + b2
    # stable log-softmax over lane-padded logits (pad logits are -1e9)
    m = jnp.max(logits, axis=-1, keepdims=True)
    lse = jnp.log(jnp.sum(jnp.exp(logits - m), axis=-1, keepdims=True)) + m
    logp_ref[...] = logits - lse          # (GB, C_pad)


def classifier_forward(node_feat, adj, n_nodes, labels,
                       s2v_params, mlp_params, *, max_lv, num_class,
                       graphs_per_step=16):
    """node_feat: (G, NP, F) f32, adj: (G, NP, NP) f32 (0/1, padded rows/cols
    zero), n_nodes: (G,) int32, labels: (G,) int32."""
    G, NP, F = node_feat.shape
    L = s2v_params["w_n2l"].shape[1]
    D = s2v_params["w_out"].shape[1]
    H = mlp_params["w1"].shape[1]
    C_pad = mlp_params["w2"].shape[1]                     # lane-padded classes

    GB = graphs_per_step                                  # graphs per grid step
    G_pad = ((G + GB - 1) // GB) * GB
    if G_pad != G:                                        # pad with empty graphs
        pad = G_pad - G
        node_feat = jnp.pad(node_feat, ((0, pad), (0, 0), (0, 0)))
        adj = jnp.pad(adj, ((0, pad), (0, 0), (0, 0)))
        n_nodes = jnp.pad(n_nodes, (0, pad))
    NG = G_pad // GB                                      # grid length (>= 2 keeps
    M = GB * NP                                           #  both v7x TCs busy)

    # ---- batched-layout glue (PrepareFeatureLabel analogue) ----
    nf = node_feat.reshape(NG, M, F)                                # (NG, M, F)
    eye_g = jnp.eye(GB, dtype=adj.dtype)
    n2n = jnp.einsum('gaij,ab->gaibj', adj.reshape(NG, GB, NP, NP), eye_g)
    n2n = n2n.reshape(NG, M, M).astype(jnp.bfloat16)                # block-diag
    valid = (jnp.arange(NP)[None, :] < n_nodes[:, None]).astype(jnp.float32)
    pool = jnp.einsum('gaj,ab->gabj', valid.reshape(NG, GB, NP),
                      jnp.eye(GB, dtype=jnp.float32)).reshape(NG, GB, M)

    # bf16 weights for the big MXU matmuls (f32 accumulation in the kernel);
    # small input projection and all biases stay f32.
    w_n2l, b_n2l = s2v_params["w_n2l"], s2v_params["b_n2l"]
    w_conv, b_conv = s2v_params["w_conv"].astype(jnp.bfloat16), s2v_params["b_conv"]
    w_out, b_out = s2v_params["w_out"].astype(jnp.bfloat16), s2v_params["b_out"]
    w1, b1 = mlp_params["w1"].astype(jnp.bfloat16), mlp_params["b1"]
    w2, b2 = mlp_params["w2"].astype(jnp.bfloat16), mlp_params["b2"]

    def full(shape):
        return pl.BlockSpec(shape, lambda g, _s=len(shape): (0,) * _s)

    grid_spec = pltpu.PrefetchScalarGridSpec(
        num_scalar_prefetch=0,
        grid=(NG,),
        in_specs=[
            pl.BlockSpec((None, M, F), lambda g: (g, 0, 0)),
            pl.BlockSpec((None, M, M), lambda g: (g, 0, 0)),
            pl.BlockSpec((None, GB, M), lambda g: (g, 0, 0)),
            full(w_n2l.shape), full(b_n2l.shape),
            full(w_conv.shape), full(b_conv.shape),
            full(w_out.shape), full(b_out.shape),
            full(w1.shape), full(b1.shape),
            full(w2.shape), full(b2.shape),
        ],
        out_specs=pl.BlockSpec((None, GB, C_pad), lambda g: (g, 0, 0)),
    )

    flops = NG * (2 * M * F * L
                  + max_lv * (2 * M * M * L + 2 * M * L * L)
                  + 2 * M * L * D
                  + 2 * GB * M * D
                  + 2 * GB * D * H
                  + 2 * GB * H * C_pad)
    weight_bytes = sum(int(a.size) * a.dtype.itemsize
                       for a in (w_n2l, b_n2l, w_conv, b_conv, w_out, b_out,
                                 w1, b1, w2, b2))
    bytes_accessed = (int(nf.size) * 4 + int(n2n.size) * 2 + int(pool.size) * 4
                      + weight_bytes + G_pad * C_pad * 4)

    logp_pad = pl.pallas_call(
        functools.partial(classifier_kernel, max_lv=max_lv),
        out_shape=jax.ShapeDtypeStruct((NG, GB, C_pad), jnp.float32),
        grid_spec=grid_spec,
        compiler_params=pltpu.CompilerParams(
            dimension_semantics=("parallel",),
            vmem_limit_bytes=32 * 1024 * 1024,
        ),
        cost_estimate=pl.CostEstimate(
            flops=flops,
            transcendentals=G_pad * C_pad,
            bytes_accessed=bytes_accessed),
    )(nf, n2n, pool,
      w_n2l, b_n2l, w_conv, b_conv, w_out, b_out,
      w1, b1, w2, b2)

    logp = logp_pad.reshape(G_pad, C_pad)[:G, :num_class]

    # nll loss + accuracy (cheap glue; matches MLPClassifier when y is given)
    loss = -jnp.mean(logp[jnp.arange(G), labels])
    pred = jnp.argmax(logp, axis=1)
    acc = jnp.mean((pred == labels).astype(jnp.float32))
    return logp, loss, acc


# ---------------------------------------------------------------------------
# Parameter init (deterministic, PyTorch nn.Linear-style uniform)
# ---------------------------------------------------------------------------
def init_linear(key, fan_in, fan_out):
    kw, kb = jax.random.split(key)
    bound = 1.0 / jnp.sqrt(jnp.float32(fan_in))
    w = jax.random.uniform(kw, (fan_in, fan_out), jnp.float32, -bound, bound)
    b = jax.random.uniform(kb, (1, fan_out), jnp.float32, -bound, bound)
    return w, b


if __name__ == "__main__":
    # cmd_args-equivalent hyperparameters (lane-friendly hidden dims = 128)
    feat_dim = 8          # node tag vocabulary (one-hot)
    attr_dim = 4          # continuous node attributes
    latent_dim = 128
    out_dim = 128         # s2v output_dim (> 0)
    hidden = 128
    num_class = 3
    max_lv = 3

    num_graphs = 32
    nodes_per_graph = 16  # per-graph node capacity (multiple of 8)
    graphs_per_step = 16  # GB*NP = 256 -> fills 256x256 MXU; NG = 2 grid steps
    F = feat_dim + attr_dim

    key = jax.random.PRNGKey(0)
    (k_tags, k_attr, k_adj, k_n, k_lab,
     k_n2l, k_conv, k_out, k_h1, k_h2) = jax.random.split(key, 10)

    # ---- PrepareFeatureLabel-equivalent glue (per-graph padded layout) ----
    n_nodes = jax.random.randint(k_n, (num_graphs,), nodes_per_graph // 2,
                                 nodes_per_graph + 1).astype(jnp.int32)
    node_ids = jnp.arange(nodes_per_graph)
    valid = (node_ids[None, :] < n_nodes[:, None]).astype(jnp.float32)  # [G,NP]

    node_tags = jax.random.randint(
        k_tags, (num_graphs, nodes_per_graph), 0, feat_dim)
    tag_onehot = jax.nn.one_hot(node_tags, feat_dim, dtype=jnp.float32)
    node_attrs = jax.random.normal(
        k_attr, (num_graphs, nodes_per_graph, attr_dim), jnp.float32)
    node_feat = jnp.concatenate([tag_onehot, node_attrs], axis=-1)
    node_feat = node_feat * valid[..., None]                # zero padded rows

    # per-graph dense symmetric 0/1 adjacency blocks (padded rows/cols zeroed)
    adj_rand = jax.random.uniform(
        k_adj, (num_graphs, nodes_per_graph, nodes_per_graph))
    adj = (adj_rand + jnp.swapaxes(adj_rand, 1, 2) > 1.0).astype(jnp.float32)
    adj = adj * (1.0 - jnp.eye(nodes_per_graph, dtype=jnp.float32)[None])
    adj = adj * valid[:, :, None] * valid[:, None, :]

    labels = jax.random.randint(k_lab, (num_graphs,), 0, num_class)

    # ---- parameters ----
    w_n2l, b_n2l = init_linear(k_n2l, F, latent_dim)
    w_conv, b_conv = init_linear(k_conv, latent_dim, latent_dim)
    w_out, b_out = init_linear(k_out, latent_dim, out_dim)
    s2v_params = dict(w_n2l=w_n2l, b_n2l=b_n2l, w_conv=w_conv, b_conv=b_conv,
                      w_out=w_out, b_out=b_out)

    w1, b1 = init_linear(k_h1, out_dim, hidden)
    w2, b2 = init_linear(k_h2, hidden, num_class)
    # lane-pad the classifier head output to 128 (zero weights, -1e9 bias so
    # padded logits vanish under log-softmax); wrapper slices back to num_class
    C_pad = ((num_class + 127) // 128) * 128
    w2 = jnp.pad(w2, ((0, 0), (0, C_pad - num_class)))
    b2 = jnp.concatenate(
        [b2, jnp.full((1, C_pad - num_class), -1e9, jnp.float32)], axis=1)
    mlp_params = dict(w1=w1, b1=b1, w2=w2, b2=b2)

    fwd = jax.jit(functools.partial(
        classifier_forward, max_lv=max_lv, num_class=num_class,
        graphs_per_step=graphs_per_step))
    logp, loss, acc = fwd(node_feat, adj, n_nodes, labels,
                          s2v_params, mlp_params)

    jax.block_until_ready((logp, loss, acc))
    assert logp.shape == (num_graphs, num_class)
    assert bool(jnp.all(jnp.isfinite(logp))) and bool(jnp.isfinite(loss))
    print("KERNEL_OK")
</pallas_src>

<mosaic_0001>
module attributes {stable_mosaic.version = 11 : i64} {
  func.func @classifier_kernel(%arg0: i32, %arg1: memref<1x256x12xf32, #tpu.memory_space<vmem>>, %arg2: memref<1x256x256xbf16, #tpu.memory_space<vmem>>, %arg3: memref<1x16x256xf32, #tpu.memory_space<vmem>>, %arg4: memref<12x128xf32, #tpu.memory_space<vmem>>, %arg5: memref<1x128xf32, #tpu.memory_space<vmem>>, %arg6: memref<128x128xbf16, #tpu.memory_space<vmem>>, %arg7: memref<1x128xf32, #tpu.memory_space<vmem>>, %arg8: memref<128x128xbf16, #tpu.memory_space<vmem>>, %arg9: memref<1x128xf32, #tpu.memory_space<vmem>>, %arg10: memref<128x128xbf16, #tpu.memory_space<vmem>>, %arg11: memref<1x128xf32, #tpu.memory_space<vmem>>, %arg12: memref<128x128xbf16, #tpu.memory_space<vmem>>, %arg13: memref<1x128xf32, #tpu.memory_space<vmem>>, %arg14: memref<1x16x128xf32, #tpu.memory_space<vmem>>) attributes {dimension_semantics = [#tpu.dimension_semantics<parallel>], iteration_bounds = array<i64: 2>, scalar_prefetch = 0 : i64, scratch_operands = 0 : i64, tpu.core_type = #tpu.core_type<tc>, window_params = [{transform_indices = @transform_0, window_bounds = array<i64: 1, 256, 12>}, {transform_indices = @transform_1, window_bounds = array<i64: 1, 256, 256>}, {transform_indices = @transform_2, window_bounds = array<i64: 1, 16, 256>}, {pipeline_mode = #tpu.pipeline_mode<synchronous>, transform_indices = @transform_3, window_bounds = array<i64: 12, 128>}, {pipeline_mode = #tpu.pipeline_mode<synchronous>, transform_indices = @transform_4, window_bounds = array<i64: 1, 128>}, {pipeline_mode = #tpu.pipeline_mode<synchronous>, transform_indices = @transform_5, window_bounds = array<i64: 128, 128>}, {pipeline_mode = #tpu.pipeline_mode<synchronous>, transform_indices = @transform_6, window_bounds = array<i64: 1, 128>}, {pipeline_mode = #tpu.pipeline_mode<synchronous>, transform_indices = @transform_7, window_bounds = array<i64: 128, 128>}, {pipeline_mode = #tpu.pipeline_mode<synchronous>, transform_indices = @transform_8, window_bounds = array<i64: 1, 128>}, {pipeline_mode = #tpu.pipeline_mode<synchronous>, transform_indices = @transform_9, window_bounds = array<i64: 128, 128>}, {pipeline_mode = #tpu.pipeline_mode<synchronous>, transform_indices = @transform_10, window_bounds = array<i64: 1, 128>}, {pipeline_mode = #tpu.pipeline_mode<synchronous>, transform_indices = @transform_11, window_bounds = array<i64: 128, 128>}, {pipeline_mode = #tpu.pipeline_mode<synchronous>, transform_indices = @transform_12, window_bounds = array<i64: 1, 128>}, {transform_indices = @transform_13, window_bounds = array<i64: 1, 16, 128>}]} {
    %c0 = arith.constant 0 : index
    %c0_0 = arith.constant 0 : index
    %c0_1 = arith.constant 0 : index
    %0 = vector.load %arg1[%c0, %c0_0, %c0_1] : memref<1x256x12xf32, #tpu.memory_space<vmem>>, vector<1x256x12xf32>
    %1 = vector.shape_cast %0 : vector<1x256x12xf32> to vector<256x12xf32>
    %c0_2 = arith.constant 0 : index
    %c0_3 = arith.constant 0 : index
    %c0_4 = arith.constant 0 : index
    %2 = vector.load %arg2[%c0_2, %c0_3, %c0_4] : memref<1x256x256xbf16, #tpu.memory_space<vmem>>, vector<1x256x256xbf16>
    %3 = vector.shape_cast %2 : vector<1x256x256xbf16> to vector<256x256xbf16>
    %c0_5 = arith.constant 0 : index
    %c0_6 = arith.constant 0 : index
    %c0_7 = arith.constant 0 : index
    %4 = vector.load %arg3[%c0_5, %c0_6, %c0_7] : memref<1x16x256xf32, #tpu.memory_space<vmem>>, vector<1x16x256xf32>
    %5 = vector.shape_cast %4 : vector<1x16x256xf32> to vector<16x256xf32>
    %c0_8 = arith.constant 0 : index
    %c0_9 = arith.constant 0 : index
    %6 = vector.load %arg4[%c0_8, %c0_9] : memref<12x128xf32, #tpu.memory_space<vmem>>, vector<12x128xf32>
    %c0_10 = arith.constant 0 : index
    %c0_11 = arith.constant 0 : index
    %7 = vector.load %arg5[%c0_10, %c0_11] : memref<1x128xf32, #tpu.memory_space<vmem>>, vector<1x128xf32>
    %c0_12 = arith.constant 0 : index
    %c0_13 = arith.constant 0 : index
    %8 = vector.load %arg6[%c0_12, %c0_13] : memref<128x128xbf16, #tpu.memory_space<vmem>>, vector<128x128xbf16>
    %c0_14 = arith.constant 0 : index
    %c0_15 = arith.constant 0 : index
    %9 = vector.load %arg7[%c0_14, %c0_15] : memref<1x128xf32, #tpu.memory_space<vmem>>, vector<1x128xf32>
    %c0_16 = arith.constant 0 : index
    %c0_17 = arith.constant 0 : index
    %10 = vector.load %arg8[%c0_16, %c0_17] : memref<128x128xbf16, #tpu.memory_space<vmem>>, vector<128x128xbf16>
    %c0_18 = arith.constant 0 : index
    %c0_19 = arith.constant 0 : index
    %11 = vector.load %arg9[%c0_18, %c0_19] : memref<1x128xf32, #tpu.memory_space<vmem>>, vector<1x128xf32>
    %c0_20 = arith.constant 0 : index
    %c0_21 = arith.constant 0 : index
    %12 = vector.load %arg10[%c0_20, %c0_21] : memref<128x128xbf16, #tpu.memory_space<vmem>>, vector<128x128xbf16>
    %c0_22 = arith.constant 0 : index
    %c0_23 = arith.constant 0 : index
    %13 = vector.load %arg11[%c0_22, %c0_23] : memref<1x128xf32, #tpu.memory_space<vmem>>, vector<1x128xf32>
    %c0_24 = arith.constant 0 : index
    %c0_25 = arith.constant 0 : index
    %14 = vector.load %arg12[%c0_24, %c0_25] : memref<128x128xbf16, #tpu.memory_space<vmem>>, vector<128x128xbf16>
    %c0_26 = arith.constant 0 : index
    %c0_27 = arith.constant 0 : index
    %15 = vector.load %arg13[%c0_26, %c0_27] : memref<1x128xf32, #tpu.memory_space<vmem>>, vector<1x128xf32>
    %cst = arith.constant dense<0.000000e+00> : vector<256x128xf32>
    %16 = tpu.matmul %1, %6, %cst {dimension_numbers = #tpu.dot_dimension_numbers<[1], [0], [0], [1], [0, 0, 1, 1], [], []>} : vector<256x12xf32>, vector<12x128xf32>, vector<256x128xf32> -> vector<256x128xf32>
    %17 = vector.broadcast %7 : vector<1x128xf32> to vector<256x128xf32>
    %18 = arith.addf %16, %17 : vector<256x128xf32>
    %cst_28 = arith.constant 0.000000e+00 : f32
    %19 = vector.broadcast %cst_28 : f32 to vector<256x128xf32>
    %20 = arith.maximumf %18, %19 : vector<256x128xf32>
    %21 = arith.truncf %20 : vector<256x128xf32> to vector<256x128xbf16>
    %cst_29 = arith.constant dense<0.000000e+00> : vector<256x128xf32>
    %22 = tpu.matmul %3, %21, %cst_29 {dimension_numbers = #tpu.dot_dimension_numbers<[1], [0], [0], [1], [0, 0, 1, 1], [], []>} : vector<256x256xbf16>, vector<256x128xbf16>, vector<256x128xf32> -> vector<256x128xf32>
    %23 = arith.truncf %22 : vector<256x128xf32> to vector<256x128xbf16>
    %cst_30 = arith.constant dense<0.000000e+00> : vector<256x128xf32>
    %24 = tpu.matmul %23, %8, %cst_30 {dimension_numbers = #tpu.dot_dimension_numbers<[1], [0], [0], [1], [0, 0, 1, 1], [], []>} : vector<256x128xbf16>, vector<128x128xbf16>, vector<256x128xf32> -> vector<256x128xf32>
    %25 = vector.broadcast %9 : vector<1x128xf32> to vector<256x128xf32>
    %26 = arith.addf %24, %25 : vector<256x128xf32>
    %27 = arith.addf %26, %18 : vector<256x128xf32>
    %cst_31 = arith.constant 0.000000e+00 : f32
    %28 = vector.broadcast %cst_31 : f32 to vector<256x128xf32>
    %29 = arith.maximumf %27, %28 : vector<256x128xf32>
    %30 = arith.truncf %29 : vector<256x128xf32> to vector<256x128xbf16>
    %cst_32 = arith.constant dense<0.000000e+00> : vector<256x128xf32>
    %31 = tpu.matmul %3, %30, %cst_32 {dimension_numbers = #tpu.dot_dimension_numbers<[1], [0], [0], [1], [0, 0, 1, 1], [], []>} : vector<256x256xbf16>, vector<256x128xbf16>, vector<256x128xf32> -> vector<256x128xf32>
    %32 = arith.truncf %31 : vector<256x128xf32> to vector<256x128xbf16>
    %cst_33 = arith.constant dense<0.000000e+00> : vector<256x128xf32>
    %33 = tpu.matmul %32, %8, %cst_33 {dimension_numbers = #tpu.dot_dimension_numbers<[1], [0], [0], [1], [0, 0, 1, 1], [], []>} : vector<256x128xbf16>, vector<128x128xbf16>, vector<256x128xf32> -> vector<256x128xf32>
    %34 = vector.broadcast %9 : vector<1x128xf32> to vector<256x128xf32>
    %35 = arith.addf %33, %34 : vector<256x128xf32>
    %36 = arith.addf %35, %18 : vector<256x128xf32>
    %cst_34 = arith.constant 0.000000e+00 : f32
    %37 = vector.broadcast %cst_34 : f32 to vector<256x128xf32>
    %38 = arith.maximumf %36, %37 : vector<256x128xf32>
    %39 = arith.truncf %38 : vector<256x128xf32> to vector<256x128xbf16>
    %cst_35 = arith.constant dense<0.000000e+00> : vector<256x128xf32>
    %40 = tpu.matmul %3, %39, %cst_35 {dimension_numbers = #tpu.dot_dimension_numbers<[1], [0], [0], [1], [0, 0, 1, 1], [], []>} : vector<256x256xbf16>, vector<256x128xbf16>, vector<256x128xf32> -> vector<256x128xf32>
    %41 = arith.truncf %40 : vector<256x128xf32> to vector<256x128xbf16>
    %cst_36 = arith.constant dense<0.000000e+00> : vector<256x128xf32>
    %42 = tpu.matmul %41, %8, %cst_36 {dimension_numbers = #tpu.dot_dimension_numbers<[1], [0], [0], [1], [0, 0, 1, 1], [], []>} : vector<256x128xbf16>, vector<128x128xbf16>, vector<256x128xf32> -> vector<256x128xf32>
    %43 = vector.broadcast %9 : vector<1x128xf32> to vector<256x128xf32>
    %44 = arith.addf %42, %43 : vector<256x128xf32>
    %45 = arith.addf %44, %18 : vector<256x128xf32>
    %cst_37 = arith.constant 0.000000e+00 : f32
    %46 = vector.broadcast %cst_37 : f32 to vector<256x128xf32>
    %47 = arith.maximumf %45, %46 : vector<256x128xf32>
    %48 = arith.truncf %47 : vector<256x128xf32> to vector<256x128xbf16>
    %cst_38 = arith.constant dense<0.000000e+00> : vector<256x128xf32>
    %49 = tpu.matmul %48, %10, %cst_38 {dimension_numbers = #tpu.dot_dimension_numbers<[1], [0], [0], [1], [0, 0, 1, 1], [], []>} : vector<256x128xbf16>, vector<128x128xbf16>, vector<256x128xf32> -> vector<256x128xf32>
    %50 = vector.broadcast %11 : vector<1x128xf32> to vector<256x128xf32>
    %51 = arith.addf %49, %50 : vector<256x128xf32>
    %cst_39 = arith.constant 0.000000e+00 : f32
    %52 = vector.broadcast %cst_39 : f32 to vector<256x128xf32>
    %53 = arith.maximumf %51, %52 : vector<256x128xf32>
    %cst_40 = arith.constant dense<0.000000e+00> : vector<16x128xf32>
    %54 = tpu.matmul %5, %53, %cst_40 {dimension_numbers = #tpu.dot_dimension_numbers<[1], [0], [0], [1], [0, 0, 1, 1], [], []>} : vector<16x256xf32>, vector<256x128xf32>, vector<16x128xf32> -> vector<16x128xf32>
    %55 = arith.truncf %54 : vector<16x128xf32> to vector<16x128xbf16>
    %cst_41 = arith.constant dense<0.000000e+00> : vector<16x128xf32>
    %56 = tpu.matmul %55, %12, %cst_41 {dimension_numbers = #tpu.dot_dimension_numbers<[1], [0], [0], [1], [0, 0, 1, 1], [], []>} : vector<16x128xbf16>, vector<128x128xbf16>, vector<16x128xf32> -> vector<16x128xf32>
    %57 = vector.broadcast %13 : vector<1x128xf32> to vector<16x128xf32>
    %58 = arith.addf %56, %57 : vector<16x128xf32>
    %cst_42 = arith.constant 0.000000e+00 : f32
    %59 = vector.broadcast %cst_42 : f32 to vector<16x128xf32>
    %60 = arith.maximumf %58, %59 : vector<16x128xf32>
    %61 = arith.truncf %60 : vector<16x128xf32> to vector<16x128xbf16>
    %cst_43 = arith.constant dense<0.000000e+00> : vector<16x128xf32>
    %62 = tpu.matmul %61, %14, %cst_43 {dimension_numbers = #tpu.dot_dimension_numbers<[1], [0], [0], [1], [0, 0, 1, 1], [], []>} : vector<16x128xbf16>, vector<128x128xbf16>, vector<16x128xf32> -> vector<16x128xf32>
    %63 = vector.broadcast %15 : vector<1x128xf32> to vector<16x128xf32>
    %64 = arith.addf %62, %63 : vector<16x128xf32>
    %cst_44 = arith.constant dense<0xFF800000> : vector<16xf32>
    %65 = vector.multi_reduction <maximumf>, %64, %cst_44 [1] : vector<16x128xf32> to vector<16xf32>
    %66 = vector.shape_cast %65 : vector<16xf32> to vector<16x1xf32>
    %67 = vector.broadcast %66 : vector<16x1xf32> to vector<16x128xf32>
    %68 = arith.subf %64, %67 : vector<16x128xf32>
    %69 = math.exp %68 : vector<16x128xf32>
    %cst_45 = arith.constant dense<0.000000e+00> : vector<16xf32>
    %70 = vector.multi_reduction <add>, %69, %cst_45 [1] : vector<16x128xf32> to vector<16xf32>
    %71 = vector.shape_cast %70 : vector<16xf32> to vector<16x1xf32>
    %72 = math.log %71 : vector<16x1xf32>
    %73 = arith.addf %72, %66 : vector<16x1xf32>
    %74 = vector.broadcast %73 : vector<16x1xf32> to vector<16x128xf32>
    %75 = arith.subf %64, %74 : vector<16x128xf32>
    %c0_46 = arith.constant 0 : index
    %c0_47 = arith.constant 0 : index
    %c0_48 = arith.constant 0 : index
    %76 = vector.load %arg14[%c0_46, %c0_47, %c0_48] : memref<1x16x128xf32, #tpu.memory_space<vmem>>, vector<1x16x128xf32>
    %77 = vector.shape_cast %76 : vector<1x16x128xf32> to vector<16x128xf32>
    %78 = vector.shape_cast %75 : vector<16x128xf32> to vector<1x16x128xf32>
    tpu.vector_store %arg14[%c0_46, %c0_47, %c0_48], %78 {strides = array<i32>} : memref<1x16x128xf32, #tpu.memory_space<vmem>>, vector<1x16x128xf32>,
    return
  }
  func.func @transform_0(%arg0: i32) -> (i32, i32, i32) {
    %c0_i32 = arith.constant 0 : i32
    %c0_i32_0 = arith.constant 0 : i32
    %c0_i32_1 = arith.constant 0 : i32
    return %arg0, %c0_i32, %c0_i32_0 : i32, i32, i32
  }
  func.func @transform_1(%arg0: i32) -> (i32, i32, i32) {
    %c0_i32 = arith.constant 0 : i32
    %c0_i32_0 = arith.constant 0 : i32
    %c0_i32_1 = arith.constant 0 : i32
    return %arg0, %c0_i32, %c0_i32_0 : i32, i32, i32
  }
  func.func @transform_2(%arg0: i32) -> (i32, i32, i32) {
    %c0_i32 = arith.constant 0 : i32
    %c0_i32_0 = arith.constant 0 : i32
    %c0_i32_1 = arith.constant 0 : i32
    return %arg0, %c0_i32, %c0_i32_0 : i32, i32, i32
  }
  func.func @transform_3(%arg0: i32) -> (i32, i32) {
    %c0_i32 = arith.constant 0 : i32
    %c0_i32_0 = arith.constant 0 : i32
    %c0_i32_1 = arith.constant 0 : i32
    return %c0_i32, %c0_i32_0 : i32, i32
  }
  func.func @transform_4(%arg0: i32) -> (i32, i32) {
    %c0_i32 = arith.constant 0 : i32
    %c0_i32_0 = arith.constant 0 : i32
    %c0_i32_1 = arith.constant 0 : i32
    return %c0_i32, %c0_i32_0 : i32, i32
  }
  func.func @transform_5(%arg0: i32) -> (i32, i32) {
    %c0_i32 = arith.constant 0 : i32
    %c0_i32_0 = arith.constant 0 : i32
    %c0_i32_1 = arith.constant 0 : i32
    return %c0_i32, %c0_i32_0 : i32, i32
  }
  func.func @transform_6(%arg0: i32) -> (i32, i32) {
    %c0_i32 = arith.constant 0 : i32
    %c0_i32_0 = arith.constant 0 : i32
    %c0_i32_1 = arith.constant 0 : i32
    return %c0_i32, %c0_i32_0 : i32, i32
  }
  func.func @transform_7(%arg0: i32) -> (i32, i32) {
    %c0_i32 = arith.constant 0 : i32
    %c0_i32_0 = arith.constant 0 : i32
    %c0_i32_1 = arith.constant 0 : i32
    return %c0_i32, %c0_i32_0 : i32, i32
  }
  func.func @transform_8(%arg0: i32) -> (i32, i32) {
    %c0_i32 = arith.constant 0 : i32
    %c0_i32_0 = arith.constant 0 : i32
    %c0_i32_1 = arith.constant 0 : i32
    return %c0_i32, %c0_i32_0 : i32, i32
  }
  func.func @transform_9(%arg0: i32) -> (i32, i32) {
    %c0_i32 = arith.constant 0 : i32
    %c0_i32_0 = arith.constant 0 : i32
    %c0_i32_1 = arith.constant 0 : i32
    return %c0_i32, %c0_i32_0 : i32, i32
  }
  func.func @transform_10(%arg0: i32) -> (i32, i32) {
    %c0_i32 = arith.constant 0 : i32
    %c0_i32_0 = arith.constant 0 : i32
    %c0_i32_1 = arith.constant 0 : i32
    return %c0_i32, %c0_i32_0 : i32, i32
  }
  func.func @transform_11(%arg0: i32) -> (i32, i32) {
    %c0_i32 = arith.constant 0 : i32
    %c0_i32_0 = arith.constant 0 : i32
    %c0_i32_1 = arith.constant 0 : i32
    return %c0_i32, %c0_i32_0 : i32, i32
  }
  func.func @transform_12(%arg0: i32) -> (i32, i32) {
    %c0_i32 = arith.constant 0 : i32
    %c0_i32_0 = arith.constant 0 : i32
    %c0_i32_1 = arith.constant 0 : i32
    return %c0_i32, %c0_i32_0 : i32, i32
  }
  func.func @transform_13(%arg0: i32) -> (i32, i32, i32) {
    %c0_i32 = arith.constant 0 : i32
    %c0_i32_0 = arith.constant 0 : i32
    %c0_i32_1 = arith.constant 0 : i32
    return %arg0, %c0_i32, %c0_i32_0 : i32, i32, i32
  }
}

</mosaic_0001>

<bundles_post_ra>
// kernel: classifier_forward.1
= control target key start
LH: loop header
LB: loop body
LE: loop exit
PB: predicated region body
PF: predicated region fallthrough
CT: control target
= control target key end

     0   :  { %s4266_s25 = smov 0   ;;  %s5200_s0 = inlined_call_operand.vmem [shape: f32[2,256,12], index: 0, kind: input, shape index: {}]   ;;  %s5201_s1 = inlined_call_operand.vmem [shape: bf16[2,256,256], index: 1, kind: input, shape index: {}]   ;;  %s5202_s2 = inlined_call_operand.vmem [shape: f32[2,16,256], index: 2, kind: input, shape index: {}]   ;;  %s5203_s3 = inlined_call_operand.vmem [shape: f32[12,128], index: 3, kind: input, shape index: {}]   ;;  %s5204_s4 = inlined_call_operand.vmem [shape: f32[1,128], index: 4, kind: input, shape index: {}]   ;;  %s5205_s5 = inlined_call_operand.vmem [shape: bf16[128,128], index: 5, kind: input, shape index: {}]   ;;  %s5206_s6 = inlined_call_operand.vmem [shape: f32[1,128], index: 6, kind: input, shape index: {}]   ;;  %s5207_s7 = inlined_call_operand.vmem [shape: bf16[128,128], index: 7, kind: input, shape index: {}]   ;;  %s5208_s8 = inlined_call_operand.vmem [shape: f32[1,128], index: 8, kind: input, shape index: {}]   ;;  %s5209_s9 = inlined_call_operand.vmem [shape: bf16[128,128], index: 9, kind: input, shape index: {}]   ;;  %s5210_s10 = inlined_call_operand.vmem [shape: f32[1,128], index: 10, kind: input, shape index: {}]   ;;  %s5211_s11 = inlined_call_operand.vmem [shape: bf16[128,128], index: 11, kind: input, shape index: {}]   ;;  %s5212_s12 = inlined_call_operand.vmem [shape: f32[1,128], index: 12, kind: input, shape index: {}]   ;;  %s5213_s13 = inlined_call_operand.vmem [shape: f32[2,16,128], index: 13, kind: output, shape index: {}]  }
   0x1 LB: > { %s3088_s26 = sadd.s32 4294967295, %s4191_s25   ;;  %p3092_p0 = scmp.ge.s32.totalorder %s4191_s25, 1  ;;  %s4191_s25 = sphi %s4266_s25, %s23_s25  }
   0x2   : > { %p407_p1 = scmp.lt.s32.totalorder %s4191_s25, 3 }
   0x4   : > { %p408_p2 = pnand %p3092_p0, %p407_p1 }
   0x6   : > { %411 = sbr.rel (%p408_p2) target bundleno = 3211 (0xc8b), region = 72 }
   0xd   : > { %v550_v0 = vld [vmem:[%s5203_s3] sm:$0xff]  ;;  %v551_v1 = vld [vmem:[%s5203_s3 + $0x8] sm:$0xf]  ;;  %vm724_vm0 = vcmask 1043456   ;;  %p461_p3 = scmp.lt.s32.totalorder %s3088_s26, 1  ;;  %vm4193_vm1 = vmmov 1  }
   0xe   : > { %v4015_v2 = vpack.c.bf16 %v551_v1, %v550_v0  ;;  %vm4016_vm2 = vmpackc.low %vm724_vm0, %vm4193_vm1  ;;  %vm627_vm3 = vcmask 97280   ;;  %v4370_v50 = vld [vmem:[%s5204_s4] ss:$0 sm:$0xff]  ;;  %vm4195_vm4 = vmmov 0  }
   0xf   : > { %s5318_s26 = smov (!%p461_p3, %s3088_s26), 1 }
  0x10   : > { %4017 = vmatprep.subr.msk.bf16.mxu0 %vm4016_vm2, %v4015_v2  ;;  %s3205_s14 = sshll.u32 %s5318_s26, 8  ;;  %s3207_s16 = sshll.u32 %s5318_s26, 5 }
  0x11   : > { %4020 = vmatpush3.bf16.msk.msra.mxu0 %vm4016_vm2, %v4015_v2  ;;  %s4286_s17 = scalar_lea.vmem %s5200_s0, %s3205_s14  ;;  %s4303_s20 = scalar_lea.vmem %s5201_s1, %s3205_s14 }
  0x12   : > { %v482_v3 = vld [vmem:[%s4286_s17] sm:$0xff]  ;;  %v483_v4 = vld [vmem:[%s4286_s17 + $0x8] sm:$0xff]  ;;  %v484_v5 = vld [vmem:[%s4286_s17 + $0x10] sm:$0xff]  ;;  %s5068_s19 = scalar_lea.vmem %s5202_s2, %s3207_s16  ;;  %s3208_s29 = sshll.u32 %s5318_s26, 4 }
  0x13   : > { %3735 = vmatprep.mubr.msk.f32.mxu0 %vm627_vm3, %v482_v3  ;;  %v485_v6 = vld [vmem:[%s4286_s17 + $0x18] sm:$0xff]  ;;  %v486_v7 = vld [vmem:[%s4286_s17 + $0x20] sm:$0xff]  ;;  %v487_v8 = vld [vmem:[%s4286_s17 + $0x28] sm:$0xff]  ;;  %s480_s14 = scalar_lea.vmem %s5213_s13, %s3208_s29 }
  0x14   : > { %3736 = vmatmul.mubr.msk.f32.vlgmr.msra.gmra.mrb[0].mxu0 %vm627_vm3, %v483_v4  ;;  %v488_v9 = vld [vmem:[%s4286_s17 + $0x30] sm:$0xff]  ;;  %v489_v10 = vld [vmem:[%s4286_s17 + $0x38] sm:$0xff]  ;;  %v490_v11 = vld [vmem:[%s4286_s17 + $0x40] sm:$0xff] }
  0x15   : > { %3738 = vmatprep.mubr.msk.f32.mxu0 %vm627_vm3, %v484_v5  ;;  %v491_v12 = vld [vmem:[%s4286_s17 + $0x48] sm:$0xff]  ;;  %v492_v13 = vld [vmem:[%s4286_s17 + $0x50] sm:$0xff]  ;;  %v493_v14 = vld [vmem:[%s4286_s17 + $0x58] sm:$0xff] }
  0x16   : > { %v494_v15 = vld [vmem:[%s4286_s17 + $0x60] sm:$0xff]  ;;  %v495_v16 = vld [vmem:[%s4286_s17 + $0x68] sm:$0xff]  ;;  %v496_v17 = vld [vmem:[%s4286_s17 + $0x70] sm:$0xff] }
  0x17   : > { %v497_v18 = vld [vmem:[%s4286_s17 + $0x78] sm:$0xff]  ;;  %v498_v19 = vld [vmem:[%s4286_s17 + $0x80] sm:$0xff]  ;;  %v499_v20 = vld [vmem:[%s4286_s17 + $0x88] sm:$0xff] }
  0x18   : > { %3739 = vmatmul.mubr.msk.f32.gmra.mrb[2].mxu0 %vm627_vm3, %v485_v6  ;;  %v500_v21 = vld [vmem:[%s4286_s17 + $0x90] sm:$0xff]  ;;  %v501_v22 = vld [vmem:[%s4286_s17 + $0x98] sm:$0xff]  ;;  %v502_v23 = vld [vmem:[%s4286_s17 + $0xa0] sm:$0xff] }
  0x19   : > { %3741 = vmatprep.mubr.msk.f32.mxu0 %vm627_vm3, %v486_v7  ;;  %v503_v24 = vld [vmem:[%s4286_s17 + $0xa8] sm:$0xff]  ;;  %v504_v25 = vld [vmem:[%s4286_s17 + $0xb0] sm:$0xff]  ;;  %v505_v26 = vld [vmem:[%s4286_s17 + $0xb8] sm:$0xff] }
  0x1a   : > { %v506_v27 = vld [vmem:[%s4286_s17 + $0xc0] sm:$0xff]  ;;  %v507_v28 = vld [vmem:[%s4286_s17 + $0xc8] sm:$0xff]  ;;  %v508_v29 = vld [vmem:[%s4286_s17 + $0xd0] sm:$0xff] }
  0x1b   : > { %v509_v30 = vld [vmem:[%s4286_s17 + $0xd8] sm:$0xff]  ;;  %v510_v31 = vld [vmem:[%s4286_s17 + $0xe0] sm:$0xff]  ;;  %v511_v32 = vld [vmem:[%s4286_s17 + $0xe8] sm:$0xff] }
  0x1c   : > { %3742 = vmatmul.mubr.msk.f32.gmra.mrb[4].mxu0 %vm627_vm3, %v487_v8  ;;  %v512_v33 = vld [vmem:[%s4286_s17 + $0xf0] sm:$0xff]  ;;  %v513_v34 = vld [vmem:[%s4286_s17 + $0xf8] sm:$0xff]  ;;  %v4358_v35 = vld [vmem:[%s4303_s20 + $0x4] ss:$8 sps:$4 sm:$0xff]  }
  0x1d   : > { %3744 = vmatprep.mubr.msk.f32.mxu0 %vm627_vm3, %v488_v9  ;;  %1193 = vmatprep.mubr.bf16.mxu1 %v4358_v35 }
  0x20   : > { %3745 = vmatmul.mubr.msk.f32.gmra.mrb[6].mxu0 %vm627_vm3, %v489_v10 }
  0x21   : > { %3747 = vmatprep.mubr.msk.f32.mxu0 %vm627_vm3, %v490_v11 }
  0x24   : > { %3748 = vmatmul.mubr.msk.f32.gmra.mrb[8].mxu0 %vm627_vm3, %v491_v12 }
  0x25   : > { %3750 = vmatprep.mubr.msk.f32.mxu0 %vm627_vm3, %v492_v13 }
  0x28   : > { %3751 = vmatmul.mubr.msk.f32.gmra.mrb[10].mxu0 %vm627_vm3, %v493_v14 }
  0x29   : > { %3753 = vmatprep.mubr.msk.f32.mxu0 %vm627_vm3, %v494_v15 }
  0x2c   : > { %3754 = vmatmul.mubr.msk.f32.gmra.mrb[12].mxu0 %vm627_vm3, %v495_v16 }
  0x2d   : > { %3756 = vmatprep.mubr.msk.f32.mxu0 %vm627_vm3, %v496_v17 }
  0x30   : > { %3757 = vmatmul.mubr.msk.f32.gmra.mrb[14].mxu0 %vm627_vm3, %v497_v18 }
  0x31   : > { %3759 = vmatprep.mubr.msk.f32.mxu0 %vm627_vm3, %v498_v19 }
  0x34   : > { %3760 = vmatmul.mubr.msk.f32.gmra.mrb[16].mxu0 %vm627_vm3, %v499_v20 }
  0x35   : > { %3762 = vmatprep.mubr.msk.f32.mxu0 %vm627_vm3, %v500_v21 }
  0x38   : > { %3763 = vmatmul.mubr.msk.f32.gmra.mrb[18].mxu0 %vm627_vm3, %v501_v22 }
  0x39   : > { %3765 = vmatprep.mubr.msk.f32.mxu0 %vm627_vm3, %v502_v23 }
  0x3c   : > { %3766 = vmatmul.mubr.msk.f32.gmra.mrb[20].mxu0 %vm627_vm3, %v503_v24 }
  0x3d   : > { %3768 = vmatprep.mubr.msk.f32.mxu0 %vm627_vm3, %v504_v25 }
  0x40   : > { %3769 = vmatmul.mubr.msk.f32.gmra.mrb[22].mxu0 %vm627_vm3, %v505_v26 }
  0x41   : > { %3771 = vmatprep.mubr.msk.f32.mxu0 %vm627_vm3, %v506_v27 }
  0x44   : > { %3772 = vmatmul.mubr.msk.f32.gmra.mrb[24].mxu0 %vm627_vm3, %v507_v28 }
  0x45   : > { %3774 = vmatprep.mubr.msk.f32.mxu0 %vm627_vm3, %v508_v29 }
  0x48   : > { %3775 = vmatmul.mubr.msk.f32.gmra.mrb[26].mxu0 %vm627_vm3, %v509_v30 }
  0x49   : > { %3777 = vmatprep.mubr.msk.f32.mxu0 %vm627_vm3, %v510_v31 }
  0x4c   : > { %3778 = vmatmul.mubr.msk.f32.gmra.mrb[28].mxu0 %vm627_vm3, %v511_v32 }
  0x4d   : > { %3780 = vmatprep.mubr.msk.f32.mxu0 %vm627_vm3, %v512_v33 }
  0x50   : > { %3781 = vmatmul.mubr.msk.f32.gmra.mrb[30].mxu0 %vm627_vm3, %v513_v34 }
  0xe7   : > { %v3737_v36 = vpop.f32.mrb[0].mxu0 }
  0xe8   : > { %v794_v37 = vpop.f32.mrb[1].mxu0  ;;  %v4377_v53 = vadd.f32 %v3737_v36, %v4370_v50 }
  0xe9   : > { %v4380_v54 = vadd.f32 %v4370_v50, %v794_v37 }
  0xea   : > { %v954_v59 = vmax.f32 %v4377_v53, 0.0 }
  0xeb   : > { %v3740_v38 = vpop.f32.mrb[2].mxu0  ;;  %v953_v63 = vmax.f32 %v4380_v54, 0.0 }
  0xec   : > { %v804_v39 = vpop.f32.mrb[3].mxu0  ;;  %v4390_v60 = vadd.f32 %v3740_v38, %v4370_v50 }
  0xed   : > { %v4393_v61 = vadd.f32 %v4370_v50, %v804_v39  ;;  %v985_v8 = vpack.c.bf16 %v954_v59, %v953_v63 }
  0xee   : > { %v956_v11 = vmax.f32 %v4390_v60, 0.0 }
  0xef   : > { %v3743_v40 = vpop.f32.mrb[4].mxu0  ;;  %v955_v10 = vmax.f32 %v4393_v61, 0.0 }
  0xf0   : > { %v814_v41 = vpop.f32.mrb[5].mxu0  ;;  %v4399_v2 = vadd.f32 %v3743_v40, %v4370_v50 }
  0xf1   : > { %v4405_v5 = vadd.f32 %v4370_v50, %v814_v41  ;;  %v986_v22 = vpack.c.bf16 %v956_v11, %v955_v10 }
  0xf2   : > { %v958_v16 = vmax.f32 %v4399_v2, 0.0 }
  0xf3   : > { %v3746_v42 = vpop.f32.mrb[6].mxu0  ;;  %v957_v20 = vmax.f32 %v4405_v5, 0.0 }
  0xf4   : > { %v824_v43 = vpop.f32.mrb[7].mxu0  ;;  %v4419_v17 = vadd.f32 %v3746_v42, %v4370_v50 }
  0xf5   : > { %v4426_v21 = vadd.f32 %v4370_v50, %v824_v43  ;;  %v987_v30 = vpack.c.bf16 %v958_v16, %v957_v20 }
  0xf6   : > { %v960_v31 = vmax.f32 %v4419_v17, 0.0 }
  0xf7   : > { %v3749_v44 = vpop.f32.mrb[8].mxu0  ;;  %v959_v36 = vmax.f32 %v4426_v21, 0.0 }
  0xf8   : > { %v834_v45 = vpop.f32.mrb[9].mxu0  ;;  %v4438_v32 = vadd.f32 %v3749_v44, %v4370_v50 }
  0xf9   : > { %v4441_v33 = vadd.f32 %v4370_v50, %v834_v45  ;;  %v988_v45 = vpack.c.bf16 %v960_v31, %v959_v36 }
  0xfb   : > { %v3752_v46 = vpop.f32.mrb[10].mxu0  ;;  %5253 = vst [vmem:[#allocation2_spill] sm:$0xff] %v4441_v33 }
  0xfc   : > { %v4361_v47 = vpop.f32.mrb[11].mxu0  ;;  %v4447_v39 = vadd.f32 %v3752_v46, %v4370_v50  ;;  %v962_v46 = vmax.f32 %v4438_v32, 0.0 }
  0xfd   : > { %v4454_v42 = vadd.f32 %v4370_v50, %v4361_v47 }
  0xff   : > { %v4363_v48 = vpop.f32.mrb[12].mxu0  ;;  %5254 = vst [vmem:[#allocation3_spill] sm:$0xff] %v4454_v42 }
 0x100   : > { %v4365_v49 = vpop.f32.mrb[13].mxu0 }
 0x103   : > { %v4372_v51 = vpop.f32.mrb[14].mxu0 }
 0x104   : > { %v4374_v52 = vpop.f32.mrb[15].mxu0 }
 0x107   : > { %v3761_v55 = vpop.f32.mrb[16].mxu0 }
 0x108   : > { %v4383_v56 = vadd.f32 %v3761_v55, %v4370_v50  ;;  %v874_v57 = vpop.f32.mrb[17].mxu0 }
 0x109   : > { %v4386_v58 = vadd.f32 %v4370_v50, %v874_v57  ;;  %v961_v57 = vmax.f32 %v4441_v33, 0.0 }
 0x10a   : > { %v970_v62 = vmax.f32 %v4383_v56, 0.0 }
 0x10b   : > { %v3764_v0 = vpop.f32.mrb[18].mxu0  ;;  %v969_v1 = vmax.f32 %v4386_v58, 0.0  ;;  %v989_v10 = vpack.c.bf16 %v962_v46, %v961_v57  ;;  %v4522_v57 = vld [vmem:[%s4303_s20] ss:$8 sps:$4 sm:$0xff]   ;;  %v4528_v46 = vld [vmem:[%s5205_s5 + $0x10] sm:$0xff]  }
 0x10c   : > { %v4402_v3 = vadd.f32 %v3764_v0, %v4370_v50  ;;  %v884_v4 = vpop.f32.mrb[19].mxu0  ;;  %v964_v0 = vmax.f32 %v4447_v39, 0.0 }
 0x10d   : > { %v4408_v6 = vadd.f32 %v4370_v50, %v884_v4  ;;  %v993_v7 = vpack.c.bf16 %v970_v62, %v969_v1  ;;  %v4469_v1 = vadd.f32 %v4363_v48, %v4370_v50 }
 0x10e   : > { %v972_v9 = vmax.f32 %v4402_v3, 0.0 }
 0x10f   : > { %v3767_v12 = vpop.f32.mrb[20].mxu0  ;;  %3243 = vmatprep.subr.bf16.mxu1 %v993_v7  ;;  %v971_v13 = vmax.f32 %v4408_v6, 0.0 }
 0x110   : > { %v4415_v14 = vadd.f32 %v3767_v12, %v4370_v50  ;;  %v894_v15 = vpop.f32.mrb[21].mxu0  ;;  %3244 = vmatpush3.bf16.msra.mxu1 %v985_v8  ;;  %v963_v8 = vmax.f32 %v4454_v42, 0.0 }
 0x111   : > { %v4422_v18 = vadd.f32 %v4370_v50, %v894_v15  ;;  %v994_v19 = vpack.c.bf16 %v972_v9, %v971_v13  ;;  %v4477_v9 = vadd.f32 %v4370_v50, %v4365_v49  ;;  %v966_v49 = vmax.f32 %v4469_v1, 0.0 }
 0x112   : > { %v974_v23 = vmax.f32 %v4415_v14, 0.0  ;;  %v990_v20 = vpack.c.bf16 %v964_v0, %v963_v8  ;;  %v4551_v0 = vld [vmem:[%s4303_s20 + $0x24] ss:$8 sps:$4 sm:$0xff]   ;;  %v4564_v8 = vld [vmem:[%s4303_s20 + $0x34] ss:$8 sps:$4 sm:$0xff]  }
 0x113   : > { %v3770_v24 = vpop.f32.mrb[22].mxu0  ;;  %3245 = vmatprep.subr.bf16.mxu1 %v994_v19  ;;  %v973_v25 = vmax.f32 %v4422_v18, 0.0  ;;  %5255 = vst [vmem:[#allocation4_spill] sm:$0xff] %v4477_v9 }
 0x114   : > { %v4431_v26 = vadd.f32 %v3770_v24, %v4370_v50  ;;  %v904_v27 = vpop.f32.mrb[23].mxu0  ;;  %3246 = vmatpush3.bf16.msra.mxu1 %v986_v22  ;;  %v4490_v22 = vadd.f32 %v4372_v51, %v4370_v50 }
 0x115   : > { %v4434_v28 = vadd.f32 %v4370_v50, %v904_v27  ;;  %v995_v29 = vpack.c.bf16 %v974_v23, %v973_v25  ;;  %v4494_v23 = vadd.f32 %v4370_v50, %v4374_v52  ;;  %v965_v25 = vmax.f32 %v4477_v9, 0.0 }
 0x116   : > { %v976_v34 = vmax.f32 %v4431_v26, 0.0 }
 0x117   : > { %v3773_v37 = vpop.f32.mrb[24].mxu0  ;;  %3247 = vmatprep.subr.bf16.mxu1 %v995_v29  ;;  %v975_v38 = vmax.f32 %v4434_v28, 0.0  ;;  %5256 = vst [vmem:[#allocation5_spill] sm:$0xff] %v4494_v23  ;;  %v991_v52 = vpack.c.bf16 %v966_v49, %v965_v25  ;;  %v4597_v49 = vld [vmem:[%s4303_s20 + $0x74] ss:$8 sps:$4 sm:$0xff]  }
 0x118   : > { %v4450_v40 = vadd.f32 %v3773_v37, %v4370_v50  ;;  %v914_v41 = vpop.f32.mrb[25].mxu0  ;;  %3248 = vmatpush3.bf16.msra.mxu1 %v987_v30  ;;  %v967_v37 = vmax.f32 %v4494_v23, 0.0  ;;  %5264 = vst [vmem:[#allocation13_spill] sm:$0xff] %v4597_v49  ;;  %v4605_v25 = vld [vmem:[%s4303_s20 + $0x84] ss:$8 sps:$4 sm:$0xff]  }
 0x119   : > { %v4457_v43 = vadd.f32 %v4370_v50, %v914_v41  ;;  %v996_v44 = vpack.c.bf16 %v976_v34, %v975_v38  ;;  %v968_v38 = vmax.f32 %v4490_v22, 0.0  ;;  %5266 = vst [vmem:[#allocation15_spill] sm:$0xff] %v4605_v25 }
 0x11a   : > { %v978_v55 = vmax.f32 %v4450_v40, 0.0 }
 0x11b   : > { %v3776_v59 = vpop.f32.mrb[26].mxu0  ;;  %3249 = vmatprep.subr.bf16.mxu1 %v996_v44  ;;  %v977_v62 = vmax.f32 %v4457_v43, 0.0  ;;  %v4512_v44 = vld [vmem:[%s5205_s5] sm:$0xff]  }
 0x11c   : > { %v4464_v63 = vadd.f32 %v3776_v59, %v4370_v50  ;;  %v924_v47 = vpop.f32.mrb[27].mxu0  ;;  %3250 = vmatpush3.bf16.msra.mxu1 %v988_v45  ;;  %3783 = vmatprep.subr.bf16.mxu0 %v4512_v44  ;;  %v4531_v59 = vld [vmem:[%s4303_s20 + $0x14] ss:$8 sps:$4 sm:$0xff]  }
 0x11d   : > { %v4472_v4 = vadd.f32 %v4370_v50, %v924_v47  ;;  %v997_v7 = vpack.c.bf16 %v978_v55, %v977_v62  ;;  %v992_v55 = vpack.c.bf16 %v968_v38, %v967_v37  ;;  %3784 = vmatpush3.bf16.msra.mxu0 %v4512_v44  ;;  %v4540_v62 = vld [vmem:[%s5205_s5 + $0x18] sm:$0xff]   ;;  %v4636_v37 = vld [vmem:[%s5205_s5 + $0x20] sm:$0xff]  }
 0x11e   : > { %v980_v11 = vmax.f32 %v4464_v63, 0.0  ;;  %v4547_v47 = vld [vmem:[%s4303_s20 + $0x10] ss:$8 sps:$4 sm:$0xff]  }
 0x11f   : > { %v3779_v12 = vpop.f32.mrb[28].mxu0  ;;  %3251 = vmatprep.subr.bf16.mxu1 %v997_v7  ;;  %v979_v13 = vmax.f32 %v4472_v4, 0.0  ;;  %v4561_v7 = vld [vmem:[%s4303_s20 + $0x20] ss:$8 sps:$4 sm:$0xff]   ;;  %v4641_v38 = vld [vmem:[%s4303_s20 + $0xb0] ss:$8 sps:$4 sm:$0xff]  }
 0x120   : > { %v4482_v48 = vadd.f32 %v3779_v12, %v4370_v50  ;;  %v934_v15 = vpop.f32.mrb[29].mxu0  ;;  %3252 = vmatpush3.bf16.msra.mxu1 %v989_v10  ;;  %v4570_v10 = vld [vmem:[%s4303_s20 + $0x30] ss:$8 sps:$4 sm:$0xff]   ;;  %v4578_v12 = vld [vmem:[%s4303_s20 + $0x40] ss:$8 sps:$4 sm:$0xff]   ;;  %5273 = vst [vmem:[#allocation22_spill] sm:$0xff] %v4641_v38 }
 0x121   : > { %v4485_v16 = vadd.f32 %v4370_v50, %v934_v15  ;;  %v998_v19 = vpack.c.bf16 %v980_v11, %v979_v13  ;;  %5257 = vst [vmem:[#allocation6_spill] sm:$0xff] %v4570_v10  ;;  %v4573_v11 = vld [vmem:[%s4303_s20 + $0x44] ss:$8 sps:$4 sm:$0xff]   ;;  %5259 = vst [vmem:[#allocation8_spill] sm:$0xff] %v4578_v12  ;;  %v4581_v13 = vld [vmem:[%s4303_s20 + $0x54] ss:$8 sps:$4 sm:$0xff]  }
 0x122   : > { %v982_v24 = vmax.f32 %v4482_v48, 0.0  ;;  %5258 = vst [vmem:[#allocation7_spill] sm:$0xff] %v4573_v11  ;;  %5260 = vst [vmem:[#allocation9_spill] sm:$0xff] %v4581_v13  ;;  %v4586_v15 = vld [vmem:[%s4303_s20 + $0x50] ss:$8 sps:$4 sm:$0xff]  }
 0x123   : > { %v3782_v27 = vpop.f32.mrb[30].mxu0  ;;  %3253 = vmatprep.subr.bf16.mxu1 %v998_v19  ;;  %v981_v29 = vmax.f32 %v4485_v16, 0.0  ;;  %5261 = vst [vmem:[#allocation10_spill] sm:$0xff] %v4586_v15  ;;  %v4589_v19 = vld [vmem:[%s4303_s20 + $0x64] ss:$8 sps:$4 sm:$0xff]  }
 0x124   : > { %v4500_v30 = vadd.f32 %v3782_v27, %v4370_v50  ;;  %v944_v31 = vpop.f32.mrb[31].mxu0  ;;  %3254 = vmatpush3.bf16.msra.mxu1 %v990_v20  ;;  %5262 = vst [vmem:[#allocation11_spill] sm:$0xff] %v4589_v19  ;;  %v4594_v20 = vld [vmem:[%s4303_s20 + $0x60] ss:$8 sps:$4 sm:$0xff]  }
 0x125   : > { %v4503_v51 = vadd.f32 %v4370_v50, %v944_v31  ;;  %v999_v34 = vpack.c.bf16 %v982_v24, %v981_v29  ;;  %v4517_v50 = vld [vmem:[%s5205_s5 + $0x8] sm:$0xff]   ;;  %5263 = vst [vmem:[#allocation12_spill] sm:$0xff] %v4594_v20  ;;  %v4602_v24 = vld [vmem:[%s4303_s20 + $0x70] ss:$8 sps:$4 sm:$0xff]   ;;  %v4613_v29 = vld [vmem:[%s4303_s20 + $0x94] ss:$8 sps:$4 sm:$0xff]  }
 0x126   : > { %v984_v36 = vmax.f32 %v4500_v30, 0.0  ;;  %3785 = vmatprep.subr.bf16.mxu0 %v4517_v50  ;;  %5265 = vst [vmem:[#allocation14_spill] sm:$0xff] %v4602_v24  ;;  %v4610_v27 = vld [vmem:[%s4303_s20 + $0x80] ss:$8 sps:$4 sm:$0xff]   ;;  %5268 = vst [vmem:[#allocation17_spill] sm:$0xff] %v4613_v29 }
 0x127   : > { %3255 = vmatprep.subr.bf16.mxu1 %v999_v34  ;;  %v983_v41 = vmax.f32 %v4503_v51, 0.0  ;;  %3786 = vmatpush3.bf16.msra.mxu0 %v4517_v50  ;;  %5267 = vst [vmem:[#allocation16_spill] sm:$0xff] %v4610_v27  ;;  %v4618_v31 = vld [vmem:[%s4303_s20 + $0x90] ss:$8 sps:$4 sm:$0xff]   ;;  %v4621_v34 = vld [vmem:[%s4303_s20 + $0xa4] ss:$8 sps:$4 sm:$0xff]  }
 0x128   : > { %3256 = vmatpush3.bf16.msra.mxu1 %v991_v52  ;;  %3787 = vmatprep.subr.bf16.mxu0 %v4528_v46  ;;  %5269 = vst [vmem:[#allocation18_spill] sm:$0xff] %v4618_v31  ;;  %5270 = vst [vmem:[#allocation19_spill] sm:$0xff] %v4621_v34  ;;  %v4626_v52 = vld [vmem:[%s4303_s20 + $0xa0] ss:$8 sps:$4 sm:$0xff]  }
 0x129   : > { %v1000_v45 = vpack.c.bf16 %v984_v36, %v983_v41  ;;  %5271 = vst [vmem:[#allocation20_spill] sm:$0xff] %v4626_v52  ;;  %v4629_v36 = vld [vmem:[%s4303_s20 + $0xb4] ss:$8 sps:$4 sm:$0xff]   ;;  %v4646_v41 = vld [vmem:[%s4303_s20 + $0xc4] ss:$8 sps:$4 sm:$0xff]  }
 0x12a   : > { %5272 = vst [vmem:[#allocation21_spill] sm:$0xff] %v4629_v36  ;;  %5274 = vst [vmem:[#allocation23_spill] sm:$0xff] %v4646_v41 }
 0x12b   : > { %3257 = vmatprep.subr.bf16.mxu1 %v1000_v45  ;;  %3788 = vmatpush3.bf16.msra.mxu0 %v4528_v46  ;;  %v4651_v45 = vld [vmem:[%s5205_s5 + $0x28] sm:$0xff]  }
 0x12c   : > { %3258 = vmatpush3.bf16.msra.mxu1 %v992_v55  ;;  %3789 = vmatprep.subr.bf16.mxu0 %v4540_v62  ;;  %5275 = vst [vmem:[#allocation24_spill] sm:$0xff] %v4651_v45  ;;  %v4661_v55 = vld [vmem:[%s5205_s5 + $0x30] sm:$0xff]  }
 0x12d   : > { %3831 = vmatprep.subr.bf16.mxu1 %v4512_v44  ;;  %5276 = vst [vmem:[#allocation25_spill] sm:$0xff] %v4661_v55 }
 0x12f   : > { %1194 = vmatmul.mubr.bf16.vlgmr.msra.gmra.mrb[0].mxu1 %v4522_v57  ;;  %3790 = vmatpush3.bf16.msra.mxu0 %v4540_v62 }
 0x130   : > { %1201 = vmatprep.mubr.bf16.mxu1 %v4531_v59  ;;  %3832 = vmatpush3.bf16.msra.mxu1 %v4512_v44 }
 0x131   : > { %3833 = vmatprep.subr.bf16.mxu1 %v4517_v50  ;;  %3791 = vmatprep.subr.bf16.mxu0 %v4636_v37 }
 0x133   : > { %3792 = vmatpush3.bf16.msra.mxu0 %v4636_v37 }
 0x134   : > { %3834 = vmatpush3.bf16.msra.mxu1 %v4517_v50  ;;  %3793 = vmatprep.subr.bf16.mxu0 %v4651_v45 }
 0x135   : > { %3835 = vmatprep.subr.bf16.mxu1 %v4528_v46 }
 0x137   : > { %1202 = vmatmul.mubr.bf16.gmra.mrb[4].mxu1 %v4547_v47  ;;  %3794 = vmatpush3.bf16.msra.mxu0 %v4651_v45 }
 0x138   : > { %1209 = vmatprep.mubr.bf16.mxu1 %v4551_v0  ;;  %3836 = vmatpush3.bf16.msra.mxu1 %v4528_v46 }
 0x139   : > { %3837 = vmatprep.subr.bf16.mxu1 %v4540_v62  ;;  %3795 = vmatprep.subr.bf16.mxu0 %v4661_v55 }
 0x13b   : > { %3796 = vmatpush3.bf16.msra.mxu0 %v4661_v55 }
 0x13c   : > { %3838 = vmatpush3.bf16.msra.mxu1 %v4540_v62 }
 0x13d   : > { %3839 = vmatprep.subr.bf16.mxu1 %v4636_v37 }
 0x13f   : > { %1210 = vmatmul.mubr.bf16.gmra.mrb[8].mxu1 %v4561_v7 }
 0x140   : > { %1217 = vmatprep.mubr.bf16.mxu1 %v4564_v8  ;;  %3840 = vmatpush3.bf16.msra.mxu1 %v4636_v37 }
 0x141   : > { %3841 = vmatprep.subr.bf16.mxu1 %v4651_v45 }
 0x144   : > { %3842 = vmatpush3.bf16.msra.mxu1 %v4651_v45 }
 0x145   : > { %3843 = vmatprep.subr.bf16.mxu1 %v4661_v55 }
 0x147   : > { %1218 = vmatmul.mubr.bf16.gmra.mrb[12].mxu1 %v4570_v10 }
 0x148   : > { %1225 = vmatprep.mubr.bf16.mxu1 %v4573_v11  ;;  %3844 = vmatpush3.bf16.msra.mxu1 %v4661_v55 }
 0x14f   : > { %1226 = vmatmul.mubr.bf16.gmra.mrb[16].mxu1 %v4578_v12 }
 0x150   : > { %1233 = vmatprep.mubr.bf16.mxu1 %v4581_v13 }
 0x157   : > { %1234 = vmatmul.mubr.bf16.gmra.mrb[20].mxu1 %v4586_v15 }
 0x158   : > { %1241 = vmatprep.mubr.bf16.mxu1 %v4589_v19 }
 0x15f   : > { %1242 = vmatmul.mubr.bf16.gmra.mrb[24].mxu1 %v4594_v20 }
 0x160   : > { %1249 = vmatprep.mubr.bf16.mxu1 %v4597_v49 }
 0x167   : > { %1250 = vmatmul.mubr.bf16.gmra.mrb[28].mxu1 %v4602_v24 }
 0x168   : > { %1257 = vmatprep.mubr.bf16.mxu1 %v4605_v25 }
 0x16f   : > { %1258 = vmatmul.mubr.bf16.gmra.mrb[32].mxu1 %v4610_v27 }
 0x170   : > { %1265 = vmatprep.mubr.bf16.mxu1 %v4613_v29  ;;  %v4697_v29 = vld [vmem:[%s4303_s20 + $0xf4] ss:$8 sps:$4 sm:$0xff]  }
 0x171   : > { %5283 = vst [vmem:[#allocation32_spill] sm:$0xff] %v4697_v29 }
 0x177   : > { %1266 = vmatmul.mubr.bf16.gmra.mrb[36].mxu1 %v4618_v31  ;;  %v4694_v31 = vld [vmem:[%s4303_s20 + $0xe0] ss:$8 sps:$4 sm:$0xff]  }
 0x178   : > { %1273 = vmatprep.mubr.bf16.mxu1 %v4621_v34  ;;  %v4689_v34 = vld [vmem:[%s4303_s20 + $0xe4] ss:$8 sps:$4 sm:$0xff]   ;;  %5282 = vst [vmem:[#allocation31_spill] sm:$0xff] %v4694_v31 }
 0x179   : > { %5281 = vst [vmem:[#allocation30_spill] sm:$0xff] %v4689_v34 }
 0x17f   : > { %1274 = vmatmul.mubr.bf16.gmra.mrb[40].mxu1 %v4626_v52  ;;  %v4686_v52 = vld [vmem:[%s4303_s20 + $0xd0] ss:$8 sps:$4 sm:$0xff]  }
 0x180   : > { %1281 = vmatprep.mubr.bf16.mxu1 %v4629_v36  ;;  %v4667_v36 = vld [vmem:[%s4303_s20 + $0xc0] ss:$8 sps:$4 sm:$0xff]   ;;  %5280 = vst [vmem:[#allocation29_spill] sm:$0xff] %v4686_v52 }
 0x181   : > { %5277 = vst [vmem:[#allocation26_spill] sm:$0xff] %v4667_v36 }
 0x187   : > { %1282 = vmatmul.mubr.bf16.gmra.mrb[44].mxu1 %v4641_v38  ;;  %v4676_v38 = vld [vmem:[%s5205_s5 + $0x38] sm:$0xff]  }
 0x188   : > { %1289 = vmatprep.mubr.bf16.mxu1 %v4646_v41  ;;  %v4671_v41 = vld [vmem:[%s4303_s20 + $0xd4] ss:$8 sps:$4 sm:$0xff]   ;;  %5279 = vst [vmem:[#allocation28_spill] sm:$0xff] %v4676_v38  ;;  %3797 = vmatprep.subr.bf16.mxu0 %v4676_v38 }
 0x189   : > { %5278 = vst [vmem:[#allocation27_spill] sm:$0xff] %v4671_v41  ;;  %3845 = vmatprep.subr.bf16.mxu1 %v4676_v38  ;;  %3798 = vmatpush3.bf16.msra.mxu0 %v4676_v38 }
 0x18a   : > { %3846 = vmatpush3.bf16.msra.mxu1 %v4676_v38 }
 0x18f   : > { %1290 = vmatmul.mubr.bf16.gmra.mrb[48].mxu1 %v4667_v36  ;;  %v4702_v36 = vld [vmem:[%s4303_s20 + $0xf0] ss:$8 sps:$4 sm:$0xff]  }
 0x190   : > { %1297 = vmatprep.mubr.bf16.mxu1 %v4671_v41  ;;  %5284 = vst [vmem:[#allocation33_spill] sm:$0xff] %v4702_v36 }
 0x197   : > { %1298 = vmatmul.mubr.bf16.gmra.mrb[52].mxu1 %v4686_v52 }
 0x198   : > { %1305 = vmatprep.mubr.bf16.mxu1 %v4689_v34 }
 0x19f   : > { %1306 = vmatmul.mubr.bf16.gmra.mrb[56].mxu1 %v4694_v31 }
 0x1a0   : > { %1313 = vmatprep.mubr.bf16.mxu1 %v4697_v29 }
 0x1a7   : > { %1314 = vmatmul.mubr.bf16.gmra.mrb[60].mxu1 %v4702_v36 }
 0x202   : > { %v3259_v41 = vpop.f32.mrb[0].mxu1 }
 0x203   : > { %v3260_v27 = vpop.f32.mrb[1].mxu1 }
 0x204   : > { %v3261_v25 = vadd.f32 %v3260_v27, %v3259_v41  ;;  %v3262_v24 = vpop.f32.mrb[2].mxu1 }
 0x205   : > { %v3263_v49 = vpop.f32.mrb[3].mxu1 }
 0x206   : > { %v3264_v52 = vadd.f32 %v3263_v49, %v3262_v24 }
 0x208   : > { %v1322_v20 = vpack.c.bf16 %v3264_v52, %v3261_v25 }
 0x20a   : > { %v3265_v34 = vpop.f32.mrb[4].mxu1  ;;  %3799 = vmatprep.mubr.bf16.mxu0 %v1322_v20 }
 0x20b   : > { %v3266_v19 = vpop.f32.mrb[5].mxu1 }
 0x20c   : > { %v3267_v15 = vadd.f32 %v3266_v19, %v3265_v34  ;;  %v3268_v13 = vpop.f32.mrb[6].mxu1 }
 0x20d   : > { %v3269_v12 = vpop.f32.mrb[7].mxu1 }
 0x20e   : > { %v3270_v31 = vadd.f32 %v3269_v12, %v3268_v13 }
 0x210   : > { %v1323_v38 = vpack.c.bf16 %v3270_v31, %v3267_v15 }
 0x212   : > { %v3271_v29 = vpop.f32.mrb[8].mxu1  ;;  %3800 = vmatmul.mubr.bf16.vlgmr.msra.gmra.mrb[32].mxu0 %v1323_v38 }
 0x213   : > { %v3272_v11 = vpop.f32.mrb[9].mxu1 }
 0x214   : > { %v3273_v10 = vadd.f32 %v3272_v11, %v3271_v29  ;;  %v3274_v36 = vpop.f32.mrb[10].mxu1 }
 0x215   : > { %v3275_v55 = vpop.f32.mrb[11].mxu1 }
 0x216   : > { %v3276_v45 = vadd.f32 %v3275_v55, %v3274_v36 }
 0x218   : > { %v1324_v27 = vpack.c.bf16 %v3276_v45, %v3273_v10 }
 0x21a   : > { %v3277_v41 = vpop.f32.mrb[12].mxu1  ;;  %3803 = vmatprep.mubr.bf16.mxu0 %v1324_v27 }
 0x21b   : > { %v3278_v49 = vpop.f32.mrb[13].mxu1 }
 0x21c   : > { %v3279_v24 = vadd.f32 %v3278_v49, %v3277_v41  ;;  %v3280_v25 = vpop.f32.mrb[14].mxu1 }
 0x21d   : > { %v3281_v20 = vpop.f32.mrb[15].mxu1 }
 0x21e   : > { %v3282_v52 = vadd.f32 %v3281_v20, %v3280_v25 }
 0x220   : > { %v1325_v19 = vpack.c.bf16 %v3282_v52, %v3279_v24 }
 0x222   : > { %v3283_v34 = vpop.f32.mrb[16].mxu1  ;;  %3804 = vmatmul.mubr.bf16.gmra.mrb[36].mxu0 %v1325_v19 }
 0x223   : > { %v3284_v12 = vpop.f32.mrb[17].mxu1 }
 0x224   : > { %v3285_v13 = vadd.f32 %v3284_v12, %v3283_v34  ;;  %v3286_v15 = vpop.f32.mrb[18].mxu1 }
 0x225   : > { %v3287_v31 = vpop.f32.mrb[19].mxu1 }
 0x226   : > { %v3288_v38 = vadd.f32 %v3287_v31, %v3286_v15 }
 0x228   : > { %v1326_v11 = vpack.c.bf16 %v3288_v38, %v3285_v13 }
 0x22a   : > { %v3289_v29 = vpop.f32.mrb[20].mxu1  ;;  %3807 = vmatprep.mubr.bf16.mxu0 %v1326_v11 }
 0x22b   : > { %v3290_v36 = vpop.f32.mrb[21].mxu1 }
 0x22c   : > { %v3291_v10 = vadd.f32 %v3290_v36, %v3289_v29  ;;  %v3292_v45 = vpop.f32.mrb[22].mxu1 }
 0x22d   : > { %v3293_v55 = vpop.f32.mrb[23].mxu1 }
 0x22e   : > { %v3294_v27 = vadd.f32 %v3293_v55, %v3292_v45 }
 0x230   : > { %v1327_v41 = vpack.c.bf16 %v3294_v27, %v3291_v10 }
 0x232   : > { %v3295_v49 = vpop.f32.mrb[24].mxu1  ;;  %3808 = vmatmul.mubr.bf16.gmra.mrb[40].mxu0 %v1327_v41 }
 0x233   : > { %v3296_v25 = vpop.f32.mrb[25].mxu1 }
 0x234   : > { %v3297_v24 = vadd.f32 %v3296_v25, %v3295_v49  ;;  %v3298_v20 = vpop.f32.mrb[26].mxu1 }
 0x235   : > { %v3299_v52 = vpop.f32.mrb[27].mxu1 }
 0x236   : > { %v3300_v19 = vadd.f32 %v3299_v52, %v3298_v20 }
 0x238   : > { %v1328_v34 = vpack.c.bf16 %v3300_v19, %v3297_v24 }
 0x23a   : > { %v3301_v12 = vpop.f32.mrb[28].mxu1  ;;  %3811 = vmatprep.mubr.bf16.mxu0 %v1328_v34 }
 0x23b   : > { %v3302_v15 = vpop.f32.mrb[29].mxu1 }
 0x23c   : > { %v3303_v13 = vadd.f32 %v3302_v15, %v3301_v12  ;;  %v3304_v31 = vpop.f32.mrb[30].mxu1 }
 0x23d   : > { %v3305_v38 = vpop.f32.mrb[31].mxu1 }
 0x23e   : > { %v3306_v11 = vadd.f32 %v3305_v38, %v3304_v31 }
 0x240   : > { %v1329_v29 = vpack.c.bf16 %v3306_v11, %v3303_v13 }
 0x242   : > { %v3307_v36 = vpop.f32.mrb[32].mxu1  ;;  %3812 = vmatmul.mubr.bf16.gmra.mrb[44].mxu0 %v1329_v29 }
 0x243   : > { %v3308_v45 = vpop.f32.mrb[33].mxu1 }
 0x244   : > { %v3309_v10 = vadd.f32 %v3308_v45, %v3307_v36  ;;  %v3310_v55 = vpop.f32.mrb[34].mxu1 }
 0x245   : > { %v3311_v27 = vpop.f32.mrb[35].mxu1 }
 0x246   : > { %v3312_v41 = vadd.f32 %v3311_v27, %v3310_v55 }
 0x248   : > { %v1330_v49 = vpack.c.bf16 %v3312_v41, %v3309_v10 }
 0x24a   : > { %v3313_v25 = vpop.f32.mrb[36].mxu1  ;;  %3815 = vmatprep.mubr.bf16.mxu0 %v1330_v49 }
 0x24b   : > { %v3314_v20 = vpop.f32.mrb[37].mxu1 }
 0x24c   : > { %v3315_v24 = vadd.f32 %v3314_v20, %v3313_v25  ;;  %v3316_v52 = vpop.f32.mrb[38].mxu1 }
 0x24d   : > { %v3317_v19 = vpop.f32.mrb[39].mxu1 }
 0x24e   : > { %v3318_v34 = vadd.f32 %v3317_v19, %v3316_v52 }
 0x250   : > { %v1331_v12 = vpack.c.bf16 %v3318_v34, %v3315_v24 }
 0x252   : > { %v3319_v15 = vpop.f32.mrb[40].mxu1  ;;  %3816 = vmatmul.mubr.bf16.gmra.mrb[48].mxu0 %v1331_v12 }
 0x253   : > { %v3320_v31 = vpop.f32.mrb[41].mxu1 }
 0x254   : > { %v3321_v13 = vadd.f32 %v3320_v31, %v3319_v15  ;;  %v3322_v38 = vpop.f32.mrb[42].mxu1 }
 0x255   : > { %v3323_v11 = vpop.f32.mrb[43].mxu1 }
 0x256   : > { %v3324_v29 = vadd.f32 %v3323_v11, %v3322_v38 }
 0x258   : > { %v1332_v36 = vpack.c.bf16 %v3324_v29, %v3321_v13 }
 0x25a   : > { %v3325_v45 = vpop.f32.mrb[44].mxu1  ;;  %3819 = vmatprep.mubr.bf16.mxu0 %v1332_v36 }
 0x25b   : > { %v3326_v55 = vpop.f32.mrb[45].mxu1 }
 0x25c   : > { %v3327_v10 = vadd.f32 %v3326_v55, %v3325_v45  ;;  %v3328_v27 = vpop.f32.mrb[46].mxu1 }
 0x25d   : > { %v3329_v41 = vpop.f32.mrb[47].mxu1 }
 0x25e   : > { %v3330_v49 = vadd.f32 %v3329_v41, %v3328_v27 }
 0x260   : > { %v1333_v25 = vpack.c.bf16 %v3330_v49, %v3327_v10 }
 0x262   : > { %v3331_v20 = vpop.f32.mrb[48].mxu1  ;;  %3820 = vmatmul.mubr.bf16.gmra.mrb[52].mxu0 %v1333_v25 }
 0x263   : > { %v3332_v52 = vpop.f32.mrb[49].mxu1 }
 0x264   : > { %v3333_v24 = vadd.f32 %v3332_v52, %v3331_v20  ;;  %v3334_v19 = vpop.f32.mrb[50].mxu1 }
 0x265   : > { %v3335_v34 = vpop.f32.mrb[51].mxu1 }
 0x266   : > { %v3336_v12 = vadd.f32 %v3335_v34, %v3334_v19 }
 0x268   : > { %v1334_v15 = vpack.c.bf16 %v3336_v12, %v3333_v24 }
 0x26a   : > { %v3337_v31 = vpop.f32.mrb[52].mxu1  ;;  %3823 = vmatprep.mubr.bf16.mxu0 %v1334_v15 }
 0x26b   : > { %v3338_v38 = vpop.f32.mrb[53].mxu1 }
 0x26c   : > { %v3339_v13 = vadd.f32 %v3338_v38, %v3337_v31  ;;  %v3340_v11 = vpop.f32.mrb[54].mxu1  ;;  %v4709_v38 = vld [vmem:[%s5206_s6] ss:$0 sm:$0xff] }
 0x26d   : > { %v3341_v29 = vpop.f32.mrb[55].mxu1 }
 0x26e   : > { %v3342_v36 = vadd.f32 %v3341_v29, %v3340_v11 }
 0x270   : > { %v1335_v45 = vpack.c.bf16 %v3342_v36, %v3339_v13 }
 0x272   : > { %v3343_v55 = vpop.f32.mrb[56].mxu1  ;;  %3824 = vmatmul.mubr.bf16.gmra.mrb[56].mxu0 %v1335_v45 }
 0x273   : > { %v3344_v27 = vpop.f32.mrb[57].mxu1 }
 0x274   : > { %v3345_v10 = vadd.f32 %v3344_v27, %v3343_v55  ;;  %v3346_v41 = vpop.f32.mrb[58].mxu1 }
 0x275   : > { %v3347_v49 = vpop.f32.mrb[59].mxu1 }
 0x276   : > { %v3348_v25 = vadd.f32 %v3347_v49, %v3346_v41 }
 0x278   : > { %v1336_v20 = vpack.c.bf16 %v3348_v25, %v3345_v10 }
 0x27a   : > { %v3349_v52 = vpop.f32.mrb[60].mxu1  ;;  %3827 = vmatprep.mubr.bf16.mxu0 %v1336_v20 }
 0x27b   : > { %v3350_v19 = vpop.f32.mrb[61].mxu1 }
 0x27c   : > { %v3351_v24 = vadd.f32 %v3350_v19, %v3349_v52  ;;  %v3352_v34 = vpop.f32.mrb[62].mxu1 }
 0x27d   : > { %v3353_v12 = vpop.f32.mrb[63].mxu1 }
 0x27e   : > { %v3354_v15 = vadd.f32 %v3353_v12, %v3352_v34 }
 0x280   : > { %v1337_v31 = vpack.c.bf16 %v3354_v15, %v3351_v24 }
 0x282   : > { %3828 = vmatmul.mubr.bf16.gmra.mrb[60].mxu0 %v1337_v31 }
 0x283   : > { %1665 = vmatprep.mubr.bf16.mxu0 %v4358_v35 }
 0x2e5   : > { %v3801_v13 = vpop.f32.mrb[32].mxu0 }
 0x2e6   : > { %v1435_v11 = vadd.f32 %v3801_v13, %v4709_v38  ;;  %v1426_v29 = vpop.f32.mrb[33].mxu0 }
 0x2e7   : > { %v1427_v36 = vadd.f32 %v4709_v38, %v1426_v29  ;;  %v3802_v45 = vpop.f32.mrb[34].mxu0 }
 0x2e8   : > { %v1555_v55 = vadd.f32 %v1435_v11, %v4393_v61  ;;  %v1438_v27 = vadd.f32 %v3802_v45, %v4709_v38  ;;  %v1429_v10 = vpop.f32.mrb[35].mxu0 }
 0x2e9   : > { %v1553_v41 = vadd.f32 %v1427_v36, %v4380_v54  ;;  %v1430_v35 = vadd.f32 %v4709_v38, %v1429_v10 }
 0x2ea   : > { %v1556_v49 = vadd.f32 %v1438_v27, %v4390_v60  ;;  %v1587_v20 = vmax.f32 %v1555_v55, 0.0 }
 0x2eb   : > { %v1554_v25 = vadd.f32 %v1430_v35, %v4377_v53  ;;  %v1585_v19 = vmax.f32 %v1553_v41, 0.0 }
 0x2ec   : > { %v1588_v52 = vmax.f32 %v1556_v49, 0.0 }
 0x2ed   : > { %v1586_v24 = vmax.f32 %v1554_v25, 0.0 }
 0x2ee   : > { %v4719_v34 = vpack.c.bf16 %v1588_v52, %v1587_v20 }
 0x2ef   : > { %v4721_v12 = vpack.c.bf16 %v1586_v24, %v1585_v19 }
 0x2f5   : > { %v3805_v15 = vpop.f32.mrb[36].mxu0 }
 0x2f6   : > { %v1451_v31 = vadd.f32 %v3805_v15, %v4709_v38  ;;  %v1442_v13 = vpop.f32.mrb[37].mxu0 }
 0x2f7   : > { %v1443_v11 = vadd.f32 %v4709_v38, %v1442_v13  ;;  %v3806_v29 = vpop.f32.mrb[38].mxu0 }
 0x2f8   : > { %v1559_v36 = vadd.f32 %v1451_v31, %v4426_v21  ;;  %v1454_v45 = vadd.f32 %v3806_v29, %v4709_v38  ;;  %v1445_v27 = vpop.f32.mrb[39].mxu0 }
 0x2f9   : > { %v1557_v55 = vadd.f32 %v1443_v11, %v4405_v5  ;;  %v1446_v10 = vadd.f32 %v4709_v38, %v1445_v27 }
 0x2fa   : > { %v1560_v41 = vadd.f32 %v1454_v45, %v4419_v17  ;;  %v1591_v49 = vmax.f32 %v1559_v36, 0.0 }
 0x2fb   : > { %v1558_v35 = vadd.f32 %v1446_v10, %v4399_v2  ;;  %v1589_v20 = vmax.f32 %v1557_v55, 0.0 }
 0x2fc   : > { %v1592_v25 = vmax.f32 %v1560_v41, 0.0 }
 0x2fd   : > { %v1590_v52 = vmax.f32 %v1558_v35, 0.0 }
 0x2fe   : > { %v4731_v19 = vpack.c.bf16 %v1592_v25, %v1591_v49 }
 0x2ff   : > { %v4733_v24 = vpack.c.bf16 %v1590_v52, %v1589_v20 }
 0x305   : > { %v3809_v15 = vpop.f32.mrb[40].mxu0 }
 0x306   : > { %v1467_v31 = vadd.f32 %v3809_v15, %v4709_v38  ;;  %v1458_v13 = vpop.f32.mrb[41].mxu0 }
 0x307   : > { %v1459_v11 = vadd.f32 %v4709_v38, %v1458_v13  ;;  %v3810_v29 = vpop.f32.mrb[42].mxu0 }
 0x308   : > { %v1563_v27 = vadd.f32 %v1467_v31, %v4454_v42  ;;  %v1470_v45 = vadd.f32 %v3810_v29, %v4709_v38  ;;  %v1461_v10 = vpop.f32.mrb[43].mxu0 }
 0x309   : > { %v1561_v36 = vadd.f32 %v1459_v11, %v4441_v33  ;;  %v1462_v55 = vadd.f32 %v4709_v38, %v1461_v10 }
 0x30a   : > { %v1564_v41 = vadd.f32 %v1470_v45, %v4447_v39  ;;  %v1595_v49 = vmax.f32 %v1563_v27, 0.0 }
 0x30b   : > { %v1562_v35 = vadd.f32 %v1462_v55, %v4438_v32  ;;  %v1593_v20 = vmax.f32 %v1561_v36, 0.0 }
 0x30c   : > { %v1596_v25 = vmax.f32 %v1564_v41, 0.0 }
 0x30d   : > { %v1594_v52 = vmax.f32 %v1562_v35, 0.0 }
 0x30e   : > { %v4743_v15 = vpack.c.bf16 %v1596_v25, %v1595_v49 }
 0x30f   : > { %v4745_v13 = vpack.c.bf16 %v1594_v52, %v1593_v20 }
 0x315   : > { %v3813_v31 = vpop.f32.mrb[44].mxu0 }
 0x316   : > { %v1483_v29 = vadd.f32 %v3813_v31, %v4709_v38  ;;  %v1474_v42 = vpop.f32.mrb[45].mxu0 }
 0x317   : > { %v1475_v11 = vadd.f32 %v4709_v38, %v1474_v42  ;;  %v3814_v33 = vpop.f32.mrb[46].mxu0 }
 0x318   : > { %v1567_v10 = vadd.f32 %v1483_v29, %v4494_v23  ;;  %v1486_v45 = vadd.f32 %v3814_v33, %v4709_v38  ;;  %v1477_v55 = vpop.f32.mrb[47].mxu0 }
 0x319   : > { %v1565_v27 = vadd.f32 %v1475_v11, %v4477_v9  ;;  %v1478_v36 = vadd.f32 %v4709_v38, %v1477_v55 }
 0x31a   : > { %v1568_v41 = vadd.f32 %v1486_v45, %v4490_v22  ;;  %v1599_v49 = vmax.f32 %v1567_v10, 0.0 }
 0x31b   : > { %v1566_v35 = vadd.f32 %v1478_v36, %v4469_v1  ;;  %v1597_v20 = vmax.f32 %v1565_v27, 0.0 }
 0x31c   : > { %v1600_v25 = vmax.f32 %v1568_v41, 0.0 }
 0x31d   : > { %v1598_v52 = vmax.f32 %v1566_v35, 0.0 }
 0x31e   : > { %v4755_v31 = vpack.c.bf16 %v1600_v25, %v1599_v49 }
 0x31f   : > { %v4757_v42 = vpack.c.bf16 %v1598_v52, %v1597_v20 }
 0x325   : > { %v3817_v29 = vpop.f32.mrb[48].mxu0 }
 0x326   : > { %v1499_v33 = vadd.f32 %v3817_v29, %v4709_v38  ;;  %v1490_v23 = vpop.f32.mrb[49].mxu0 }
 0x327   : > { %v1491_v11 = vadd.f32 %v4709_v38, %v1490_v23  ;;  %v3818_v9 = vpop.f32.mrb[50].mxu0 }
 0x328   : > { %v1571_v55 = vadd.f32 %v1499_v33, %v4408_v6  ;;  %v1502_v45 = vadd.f32 %v3818_v9, %v4709_v38  ;;  %v1493_v36 = vpop.f32.mrb[51].mxu0 }
 0x329   : > { %v1569_v10 = vadd.f32 %v1491_v11, %v4386_v58  ;;  %v1494_v27 = vadd.f32 %v4709_v38, %v1493_v36 }
 0x32a   : > { %v1572_v41 = vadd.f32 %v1502_v45, %v4402_v3  ;;  %v1603_v49 = vmax.f32 %v1571_v55, 0.0 }
 0x32b   : > { %v1570_v35 = vadd.f32 %v1494_v27, %v4383_v56  ;;  %v1601_v20 = vmax.f32 %v1569_v10, 0.0 }
 0x32c   : > { %v1604_v25 = vmax.f32 %v1572_v41, 0.0 }
 0x32d   : > { %v1602_v52 = vmax.f32 %v1570_v35, 0.0 }
 0x32e   : > { %v1626_v29 = vpack.c.bf16 %v1604_v25, %v1603_v49 }
 0x32f   : > { %v1625_v23 = vpack.c.bf16 %v1602_v52, %v1601_v20 }
 0x331   : > { %3379 = vmatprep.subr.bf16.mxu0 %v1625_v23 }
 0x332   : > { %3380 = vmatpush3.bf16.msra.mxu0 %v4721_v12 }
 0x333   : > { %3381 = vmatprep.subr.bf16.mxu0 %v1626_v29 }
 0x335   : > { %v3821_v9 = vpop.f32.mrb[52].mxu0 }
 0x336   : > { %v1515_v33 = vadd.f32 %v3821_v9, %v4709_v38  ;;  %v1506_v11 = vpop.f32.mrb[53].mxu0  ;;  %3382 = vmatpush3.bf16.msra.mxu0 %v4719_v34 }
 0x337   : > { %v1507_v45 = vadd.f32 %v4709_v38, %v1506_v11  ;;  %v3822_v36 = vpop.f32.mrb[54].mxu0 }
 0x338   : > { %v1575_v55 = vadd.f32 %v1515_v33, %v4434_v28  ;;  %v1518_v10 = vadd.f32 %v3822_v36, %v4709_v38  ;;  %v1509_v27 = vpop.f32.mrb[55].mxu0 }
 0x339   : > { %v1573_v41 = vadd.f32 %v1507_v45, %v4422_v18  ;;  %v1510_v35 = vadd.f32 %v4709_v38, %v1509_v27 }
 0x33a   : > { %v1576_v12 = vadd.f32 %v1518_v10, %v4431_v26  ;;  %v1607_v25 = vmax.f32 %v1575_v55, 0.0 }
 0x33b   : > { %v1574_v49 = vadd.f32 %v1510_v35, %v4415_v14  ;;  %v1605_v52 = vmax.f32 %v1573_v41, 0.0 }
 0x33c   : > { %v1608_v20 = vmax.f32 %v1576_v12, 0.0 }
 0x33d   : > { %v1606_v34 = vmax.f32 %v1574_v49, 0.0 }
 0x33e   : > { %v1628_v29 = vpack.c.bf16 %v1608_v20, %v1607_v25 }
 0x33f   : > { %v1627_v23 = vpack.c.bf16 %v1606_v34, %v1605_v52 }
 0x341   : > { %3383 = vmatprep.subr.bf16.mxu0 %v1627_v23 }
 0x342   : > { %3384 = vmatpush3.bf16.msra.mxu0 %v4733_v24 }
 0x343   : > { %3385 = vmatprep.subr.bf16.mxu0 %v1628_v29 }
 0x345   : > { %v3825_v9 = vpop.f32.mrb[56].mxu0 }
 0x346   : > { %v1531_v33 = vadd.f32 %v3825_v9, %v4709_v38  ;;  %v1522_v11 = vpop.f32.mrb[57].mxu0  ;;  %3386 = vmatpush3.bf16.msra.mxu0 %v4731_v19 }
 0x347   : > { %v1523_v45 = vadd.f32 %v4709_v38, %v1522_v11  ;;  %v3826_v36 = vpop.f32.mrb[58].mxu0 }
 0x348   : > { %v1579_v55 = vadd.f32 %v1531_v33, %v4472_v4  ;;  %v1534_v10 = vadd.f32 %v3826_v36, %v4709_v38  ;;  %v1525_v27 = vpop.f32.mrb[59].mxu0 }
 0x349   : > { %v1577_v41 = vadd.f32 %v1523_v45, %v4457_v43  ;;  %v1526_v35 = vadd.f32 %v4709_v38, %v1525_v27 }
 0x34a   : > { %v1580_v24 = vadd.f32 %v1534_v10, %v4464_v63  ;;  %v1611_v49 = vmax.f32 %v1579_v55, 0.0 }
 0x34b   : > { %v1578_v12 = vadd.f32 %v1526_v35, %v4450_v40  ;;  %v1609_v20 = vmax.f32 %v1577_v41, 0.0 }
 0x34c   : > { %v1612_v25 = vmax.f32 %v1580_v24, 0.0 }
 0x34d   : > { %v1610_v19 = vmax.f32 %v1578_v12, 0.0 }
 0x34e   : > { %v1630_v52 = vpack.c.bf16 %v1612_v25, %v1611_v49 }
 0x34f   : > { %v1629_v34 = vpack.c.bf16 %v1610_v19, %v1609_v20  ;;  %v5298_v20 = vld [vmem:[#allocation16_spill] sm:$0xff]  ;;  %v5299_v19 = vld [vmem:[#allocation17_spill] sm:$0xff] }
 0x351   : > { %3387 = vmatprep.subr.bf16.mxu0 %v1629_v34  ;;  %v5301_v34 = vld [vmem:[#allocation19_spill] sm:$0xff] }
 0x352   : > { %3388 = vmatpush3.bf16.msra.mxu0 %v4745_v13 }
 0x353   : > { %3389 = vmatprep.subr.bf16.mxu0 %v1630_v52  ;;  %v5300_v52 = vld [vmem:[#allocation18_spill] sm:$0xff] }
 0x355   : > { %v3829_v29 = vpop.f32.mrb[60].mxu0 }
 0x356   : > { %v1547_v23 = vadd.f32 %v3829_v29, %v4709_v38  ;;  %v1538_v9 = vpop.f32.mrb[61].mxu0  ;;  %3390 = vmatpush3.bf16.msra.mxu0 %v4743_v15  ;;  %v5302_v29 = vld [vmem:[#allocation20_spill] sm:$0xff] }
 0x357   : > { %v1539_v33 = vadd.f32 %v4709_v38, %v1538_v9  ;;  %v3830_v11 = vpop.f32.mrb[62].mxu0  ;;  %v5304_v9 = vld [vmem:[#allocation22_spill] sm:$0xff] }
 0x358   : > { %v1583_v45 = vadd.f32 %v1547_v23, %v4503_v51  ;;  %v1550_v36 = vadd.f32 %v3830_v11, %v4709_v38  ;;  %v1541_v55 = vpop.f32.mrb[63].mxu0  ;;  %v5303_v23 = vld [vmem:[#allocation21_spill] sm:$0xff]  ;;  %v5306_v11 = vld [vmem:[#allocation26_spill] sm:$0xff] }
 0x359   : > { %v1581_v10 = vadd.f32 %v1539_v33, %v4485_v16  ;;  %v1542_v27 = vadd.f32 %v4709_v38, %v1541_v55  ;;  %v5305_v33 = vld [vmem:[#allocation23_spill] sm:$0xff]  ;;  %v5309_v55 = vld [vmem:[#allocation30_spill] sm:$0xff] }
 0x35a   : > { %v1584_v13 = vadd.f32 %v1550_v36, %v4500_v30  ;;  %v1615_v35 = vmax.f32 %v1583_v45, 0.0  ;;  %v5307_v45 = vld [vmem:[#allocation27_spill] sm:$0xff]  ;;  %v5308_v36 = vld [vmem:[#allocation29_spill] sm:$0xff] }
 0x35b   : > { %v1582_v41 = vadd.f32 %v1542_v27, %v4482_v48  ;;  %v1613_v12 = vmax.f32 %v1581_v10, 0.0  ;;  %v5310_v10 = vld [vmem:[#allocation31_spill] sm:$0xff]  ;;  %v5311_v27 = vld [vmem:[#allocation32_spill] sm:$0xff] }
 0x35c   : > { %v1616_v24 = vmax.f32 %v1584_v13, 0.0  ;;  %v5312_v13 = vld [vmem:[#allocation33_spill] sm:$0xff] }
 0x35d   : > { %v1614_v15 = vmax.f32 %v1582_v41, 0.0 }
 0x35e   : > { %v1632_v49 = vpack.c.bf16 %v1616_v24, %v1615_v35 }
 0x35f   : > { %v1631_v25 = vpack.c.bf16 %v1614_v15, %v1613_v12 }
 0x361   : > { %3391 = vmatprep.subr.bf16.mxu0 %v1631_v25 }
 0x362   : > { %3392 = vmatpush3.bf16.msra.mxu0 %v4757_v42  ;;  %v5297_v42 = vld [vmem:[#allocation15_spill] sm:$0xff] }
 0x363   : > { %3393 = vmatprep.subr.bf16.mxu0 %v1632_v49 }
 0x366   : > { %3394 = vmatpush3.bf16.msra.mxu0 %v4755_v31  ;;  %v5296_v31 = vld [vmem:[#allocation14_spill] sm:$0xff] }
 0x367   : > { %3879 = vmatprep.subr.bf16.mxu0 %v4512_v44 }
 0x369   : > { %1666 = vmatmul.mubr.bf16.vlgmr.msra.gmra.mrb[64].mxu0 %v4522_v57  ;;  %v5287_v57 = vld [vmem:[#allocation6_spill] sm:$0xff] }
 0x36a   : > { %1673 = vmatprep.mubr.bf16.mxu0 %v4531_v59  ;;  %3880 = vmatpush3.bf16.msra.mxu0 %v4512_v44  ;;  %v5285_v44 = vld [vmem:[#allocation24_spill] sm:$0xff] }
 0x36b   : > { %3881 = vmatprep.subr.bf16.mxu0 %v4517_v50  ;;  %v5289_v59 = vld [vmem:[#allocation28_spill] sm:$0xff] }
 0x36e   : > { %3882 = vmatpush3.bf16.msra.mxu0 %v4517_v50  ;;  %v5286_v50 = vld [vmem:[#allocation25_spill] sm:$0xff] }
 0x36f   : > { %3883 = vmatprep.subr.bf16.mxu0 %v4528_v46 }
 0x371   : > { %1674 = vmatmul.mubr.bf16.gmra.mrb[68].mxu0 %v4547_v47  ;;  %v5291_v47 = vld [vmem:[#allocation9_spill] sm:$0xff] }
 0x372   : > { %1681 = vmatprep.mubr.bf16.mxu0 %v4551_v0  ;;  %3884 = vmatpush3.bf16.msra.mxu0 %v4528_v46  ;;  %v5288_v46 = vld [vmem:[#allocation7_spill] sm:$0xff]  ;;  %v5292_v0 = vld [vmem:[#allocation10_spill] sm:$0xff] }
 0x373   : > { %3885 = vmatprep.subr.bf16.mxu0 %v4540_v62 }
 0x376   : > { %3886 = vmatpush3.bf16.msra.mxu0 %v4540_v62  ;;  %v5290_v62 = vld [vmem:[#allocation8_spill] sm:$0xff] }
 0x377   : > { %3887 = vmatprep.subr.bf16.mxu0 %v4636_v37 }
 0x379   : > { %1682 = vmatmul.mubr.bf16.gmra.mrb[72].mxu0 %v4561_v7  ;;  %v5293_v7 = vld [vmem:[#allocation11_spill] sm:$0xff] }
 0x37a   : > { %1689 = vmatprep.mubr.bf16.mxu0 %v4564_v8  ;;  %3888 = vmatpush3.bf16.msra.mxu0 %v4636_v37  ;;  %v5294_v8 = vld [vmem:[#allocation12_spill] sm:$0xff]  ;;  %v5295_v37 = vld [vmem:[#allocation13_spill] sm:$0xff] }
 0x37b   : > { %3889 = vmatprep.subr.bf16.mxu0 %v5285_v44 }
 0x37e   : > { %3890 = vmatpush3.bf16.msra.mxu0 %v5285_v44 }
 0x37f   : > { %3891 = vmatprep.subr.bf16.mxu0 %v5286_v50 }
 0x381   : > { %1690 = vmatmul.mubr.bf16.gmra.mrb[76].mxu0 %v5287_v57 }
 0x382   : > { %1697 = vmatprep.mubr.bf16.mxu0 %v5288_v46  ;;  %3892 = vmatpush3.bf16.msra.mxu0 %v5286_v50 }
 0x383   : > { %3893 = vmatprep.subr.bf16.mxu0 %v5289_v59 }
 0x386   : > { %3894 = vmatpush3.bf16.msra.mxu0 %v5289_v59 }
 0x389   : > { %1698 = vmatmul.mubr.bf16.gmra.mrb[80].mxu0 %v5290_v62 }
 0x38a   : > { %1705 = vmatprep.mubr.bf16.mxu0 %v5291_v47 }
 0x391   : > { %1706 = vmatmul.mubr.bf16.gmra.mrb[84].mxu0 %v5292_v0 }
 0x392   : > { %1713 = vmatprep.mubr.bf16.mxu0 %v5293_v7 }
 0x399   : > { %1714 = vmatmul.mubr.bf16.gmra.mrb[88].mxu0 %v5294_v8 }
 0x39a   : > { %1721 = vmatprep.mubr.bf16.mxu0 %v5295_v37 }
 0x3a1   : > { %1722 = vmatmul.mubr.bf16.gmra.mrb[92].mxu0 %v5296_v31 }
 0x3a2   : > { %1729 = vmatprep.mubr.bf16.mxu0 %v5297_v42 }
 0x3a9   : > { %1730 = vmatmul.mubr.bf16.gmra.mrb[96].mxu0 %v5298_v20 }
 0x3aa   : > { %1737 = vmatprep.mubr.bf16.mxu0 %v5299_v19 }
 0x3b1   : > { %1738 = vmatmul.mubr.bf16.gmra.mrb[100].mxu0 %v5300_v52 }
 0x3b2   : > { %1745 = vmatprep.mubr.bf16.mxu0 %v5301_v34 }
 0x3b9   : > { %1746 = vmatmul.mubr.bf16.gmra.mrb[104].mxu0 %v5302_v29 }
 0x3ba   : > { %1753 = vmatprep.mubr.bf16.mxu0 %v5303_v23 }
 0x3c1   : > { %1754 = vmatmul.mubr.bf16.gmra.mrb[108].mxu0 %v5304_v9 }
 0x3c2   : > { %1761 = vmatprep.mubr.bf16.mxu0 %v5305_v33 }
 0x3c9   : > { %1762 = vmatmul.mubr.bf16.gmra.mrb[112].mxu0 %v5306_v11 }
 0x3ca   : > { %1769 = vmatprep.mubr.bf16.mxu0 %v5307_v45 }
 0x3d1   : > { %1770 = vmatmul.mubr.bf16.gmra.mrb[116].mxu0 %v5308_v36 }
 0x3d2   : > { %1777 = vmatprep.mubr.bf16.mxu0 %v5309_v55 }
 0x3d9   : > { %1778 = vmatmul.mubr.bf16.gmra.mrb[120].mxu0 %v5310_v10 }
 0x3da   : > { %1785 = vmatprep.mubr.bf16.mxu0 %v5311_v27 }
 0x3e1   : > { %1786 = vmatmul.mubr.bf16.gmra.mrb[124].mxu0 %v5312_v13 }
 0x43c   : > { %v3395_v41 = vpop.f32.mrb[64].mxu0 }
 0x43d   : > { %v3396_v35 = vpop.f32.mrb[65].mxu0 }
 0x43e   : > { %v3397_v24 = vadd.f32 %v3396_v35, %v3395_v41  ;;  %v3398_v12 = vpop.f32.mrb[66].mxu0 }
 0x43f   : > { %v3399_v15 = vpop.f32.mrb[67].mxu0 }
 0x440   : > { %v3400_v49 = vadd.f32 %v3399_v15, %v3398_v12 }
 0x442   : > { %v1794_v25 = vpack.c.bf16 %v3400_v49, %v3397_v24 }
 0x444   : > { %v3401_v44 = vpop.f32.mrb[68].mxu0  ;;  %3847 = vmatprep.mubr.bf16.mxu1 %v1794_v25 }
 0x445   : > { %v3402_v50 = vpop.f32.mrb[69].mxu0 }
 0x446   : > { %v3403_v57 = vadd.f32 %v3402_v50, %v3401_v44  ;;  %v3404_v46 = vpop.f32.mrb[70].mxu0 }
 0x447   : > { %v3405_v59 = vpop.f32.mrb[71].mxu0 }
 0x448   : > { %v3406_v62 = vadd.f32 %v3405_v59, %v3404_v46 }
 0x44a   : > { %v1795_v47 = vpack.c.bf16 %v3406_v62, %v3403_v57 }
 0x44c   : > { %v3407_v0 = vpop.f32.mrb[72].mxu0  ;;  %3848 = vmatmul.mubr.bf16.vlgmr.msra.gmra.mrb[64].mxu1 %v1795_v47 }
 0x44d   : > { %v3408_v7 = vpop.f32.mrb[73].mxu0 }
 0x44e   : > { %v3409_v8 = vadd.f32 %v3408_v7, %v3407_v0  ;;  %v3410_v37 = vpop.f32.mrb[74].mxu0 }
 0x44f   : > { %v3411_v31 = vpop.f32.mrb[75].mxu0 }
 0x450   : > { %v3412_v42 = vadd.f32 %v3411_v31, %v3410_v37 }
 0x452   : > { %v1796_v20 = vpack.c.bf16 %v3412_v42, %v3409_v8 }
 0x454   : > { %v3413_v19 = vpop.f32.mrb[76].mxu0  ;;  %3851 = vmatprep.mubr.bf16.mxu1 %v1796_v20 }
 0x455   : > { %v3414_v52 = vpop.f32.mrb[77].mxu0 }
 0x456   : > { %v3415_v34 = vadd.f32 %v3414_v52, %v3413_v19  ;;  %v3416_v29 = vpop.f32.mrb[78].mxu0 }
 0x457   : > { %v3417_v23 = vpop.f32.mrb[79].mxu0 }
 0x458   : > { %v3418_v9 = vadd.f32 %v3417_v23, %v3416_v29 }
 0x45a   : > { %v1797_v33 = vpack.c.bf16 %v3418_v9, %v3415_v34 }
 0x45c   : > { %v3419_v11 = vpop.f32.mrb[80].mxu0  ;;  %3852 = vmatmul.mubr.bf16.gmra.mrb[68].mxu1 %v1797_v33 }
 0x45d   : > { %v3420_v45 = vpop.f32.mrb[81].mxu0 }
 0x45e   : > { %v3421_v36 = vadd.f32 %v3420_v45, %v3419_v11  ;;  %v3422_v55 = vpop.f32.mrb[82].mxu0 }
 0x45f   : > { %v3423_v10 = vpop.f32.mrb[83].mxu0 }
 0x460   : > { %v3424_v27 = vadd.f32 %v3423_v10, %v3422_v55 }
 0x462   : > { %v1798_v13 = vpack.c.bf16 %v3424_v27, %v3421_v36 }
 0x464   : > { %v3425_v41 = vpop.f32.mrb[84].mxu0  ;;  %3855 = vmatprep.mubr.bf16.mxu1 %v1798_v13 }
 0x465   : > { %v3426_v35 = vpop.f32.mrb[85].mxu0 }
 0x466   : > { %v3427_v24 = vadd.f32 %v3426_v35, %v3425_v41  ;;  %v3428_v12 = vpop.f32.mrb[86].mxu0 }
 0x467   : > { %v3429_v15 = vpop.f32.mrb[87].mxu0 }
 0x468   : > { %v3430_v49 = vadd.f32 %v3429_v15, %v3428_v12 }
 0x46a   : > { %v1799_v25 = vpack.c.bf16 %v3430_v49, %v3427_v24 }
 0x46c   : > { %v3431_v44 = vpop.f32.mrb[88].mxu0  ;;  %3856 = vmatmul.mubr.bf16.gmra.mrb[72].mxu1 %v1799_v25 }
 0x46d   : > { %v3432_v50 = vpop.f32.mrb[89].mxu0 }
 0x46e   : > { %v3433_v57 = vadd.f32 %v3432_v50, %v3431_v44  ;;  %v3434_v46 = vpop.f32.mrb[90].mxu0 }
 0x46f   : > { %v3435_v59 = vpop.f32.mrb[91].mxu0 }
 0x470   : > { %v3436_v62 = vadd.f32 %v3435_v59, %v3434_v46 }
 0x472   : > { %v1800_v47 = vpack.c.bf16 %v3436_v62, %v3433_v57 }
 0x474   : > { %v3437_v0 = vpop.f32.mrb[92].mxu0  ;;  %3859 = vmatprep.mubr.bf16.mxu1 %v1800_v47 }
 0x475   : > { %v3438_v7 = vpop.f32.mrb[93].mxu0 }
 0x476   : > { %v3439_v8 = vadd.f32 %v3438_v7, %v3437_v0  ;;  %v3440_v37 = vpop.f32.mrb[94].mxu0 }
 0x477   : > { %v3441_v31 = vpop.f32.mrb[95].mxu0 }
 0x478   : > { %v3442_v42 = vadd.f32 %v3441_v31, %v3440_v37 }
 0x47a   : > { %v1801_v20 = vpack.c.bf16 %v3442_v42, %v3439_v8 }
 0x47c   : > { %v3443_v19 = vpop.f32.mrb[96].mxu0  ;;  %3860 = vmatmul.mubr.bf16.gmra.mrb[76].mxu1 %v1801_v20 }
 0x47d   : > { %v3444_v52 = vpop.f32.mrb[97].mxu0 }
 0x47e   : > { %v3445_v34 = vadd.f32 %v3444_v52, %v3443_v19  ;;  %v3446_v29 = vpop.f32.mrb[98].mxu0 }
 0x47f   : > { %v3447_v23 = vpop.f32.mrb[99].mxu0 }
 0x480   : > { %v3448_v9 = vadd.f32 %v3447_v23, %v3446_v29 }
 0x482   : > { %v1802_v33 = vpack.c.bf16 %v3448_v9, %v3445_v34 }
 0x484   : > { %v3449_v11 = vpop.f32.mrb[100].mxu0  ;;  %3863 = vmatprep.mubr.bf16.mxu1 %v1802_v33 }
 0x485   : > { %v3450_v45 = vpop.f32.mrb[101].mxu0 }
 0x486   : > { %v3451_v36 = vadd.f32 %v3450_v45, %v3449_v11  ;;  %v3452_v55 = vpop.f32.mrb[102].mxu0 }
 0x487   : > { %v3453_v10 = vpop.f32.mrb[103].mxu0 }
 0x488   : > { %v3454_v27 = vadd.f32 %v3453_v10, %v3452_v55 }
 0x48a   : > { %v1803_v13 = vpack.c.bf16 %v3454_v27, %v3451_v36 }
 0x48c   : > { %v3455_v41 = vpop.f32.mrb[104].mxu0  ;;  %3864 = vmatmul.mubr.bf16.gmra.mrb[80].mxu1 %v1803_v13 }
 0x48d   : > { %v3456_v35 = vpop.f32.mrb[105].mxu0 }
 0x48e   : > { %v3457_v24 = vadd.f32 %v3456_v35, %v3455_v41  ;;  %v3458_v12 = vpop.f32.mrb[106].mxu0 }
 0x48f   : > { %v3459_v15 = vpop.f32.mrb[107].mxu0 }
 0x490   : > { %v3460_v49 = vadd.f32 %v3459_v15, %v3458_v12 }
 0x492   : > { %v1804_v25 = vpack.c.bf16 %v3460_v49, %v3457_v24 }
 0x494   : > { %v3461_v44 = vpop.f32.mrb[108].mxu0  ;;  %3867 = vmatprep.mubr.bf16.mxu1 %v1804_v25 }
 0x495   : > { %v3462_v50 = vpop.f32.mrb[109].mxu0 }
 0x496   : > { %v3463_v57 = vadd.f32 %v3462_v50, %v3461_v44  ;;  %v3464_v46 = vpop.f32.mrb[110].mxu0  ;;  %v4152_v44 = vld [vmem:[%s4303_s20 + $0x4] ss:$8 sps:$4 sm:$0xff]  }
 0x497   : > { %v3465_v59 = vpop.f32.mrb[111].mxu0 }
 0x498   : > { %v3466_v62 = vadd.f32 %v3465_v59, %v3464_v46 }
 0x49a   : > { %v1805_v47 = vpack.c.bf16 %v3466_v62, %v3463_v57 }
 0x49c   : > { %v3467_v0 = vpop.f32.mrb[112].mxu0  ;;  %3868 = vmatmul.mubr.bf16.gmra.mrb[84].mxu1 %v1805_v47 }
 0x49d   : > { %v3468_v7 = vpop.f32.mrb[113].mxu0 }
 0x49e   : > { %v3469_v8 = vadd.f32 %v3468_v7, %v3467_v0  ;;  %v3470_v37 = vpop.f32.mrb[114].mxu0 }
 0x49f   : > { %v3471_v31 = vpop.f32.mrb[115].mxu0 }
 0x4a0   : > { %v3472_v42 = vadd.f32 %v3471_v31, %v3470_v37 }
 0x4a2   : > { %v1806_v20 = vpack.c.bf16 %v3472_v42, %v3469_v8 }
 0x4a4   : > { %v3473_v19 = vpop.f32.mrb[116].mxu0  ;;  %3871 = vmatprep.mubr.bf16.mxu1 %v1806_v20 }
 0x4a5   : > { %v3474_v52 = vpop.f32.mrb[117].mxu0 }
 0x4a6   : > { %v3475_v34 = vadd.f32 %v3474_v52, %v3473_v19  ;;  %v3476_v29 = vpop.f32.mrb[118].mxu0 }
 0x4a7   : > { %v3477_v23 = vpop.f32.mrb[119].mxu0 }
 0x4a8   : > { %v3478_v9 = vadd.f32 %v3477_v23, %v3476_v29 }
 0x4aa   : > { %v1807_v33 = vpack.c.bf16 %v3478_v9, %v3475_v34 }
 0x4ac   : > { %v3479_v11 = vpop.f32.mrb[120].mxu0  ;;  %3872 = vmatmul.mubr.bf16.gmra.mrb[88].mxu1 %v1807_v33 }
 0x4ad   : > { %v3480_v45 = vpop.f32.mrb[121].mxu0 }
 0x4ae   : > { %v3481_v36 = vadd.f32 %v3480_v45, %v3479_v11  ;;  %v3482_v55 = vpop.f32.mrb[122].mxu0 }
 0x4af   : > { %v3483_v10 = vpop.f32.mrb[123].mxu0 }
 0x4b0   : > { %v3484_v27 = vadd.f32 %v3483_v10, %v3482_v55 }
 0x4b2   : > { %v1808_v13 = vpack.c.bf16 %v3484_v27, %v3481_v36 }
 0x4b4   : > { %v3485_v41 = vpop.f32.mrb[124].mxu0  ;;  %3875 = vmatprep.mubr.bf16.mxu1 %v1808_v13 }
 0x4b5   : > { %v3486_v35 = vpop.f32.mrb[125].mxu0 }
 0x4b6   : > { %v3487_v24 = vadd.f32 %v3486_v35, %v3485_v41  ;;  %v3488_v12 = vpop.f32.mrb[126].mxu0 }
 0x4b7   : > { %v3489_v15 = vpop.f32.mrb[127].mxu0 }
 0x4b8   : > { %v3490_v49 = vadd.f32 %v3489_v15, %v3488_v12 }
 0x4ba   : > { %v1809_v25 = vpack.c.bf16 %v3490_v49, %v3487_v24 }
 0x4bc   : > { %3876 = vmatmul.mubr.bf16.gmra.mrb[92].mxu1 %v1809_v25 }
 0x4bd   : > { %2083 = vmatprep.mubr.bf16.mxu1 %v4152_v44 }
 0x51f   : > { %v3849_v50 = vpop.f32.mrb[64].mxu1 }
 0x520   : > { %v1853_v57 = vadd.f32 %v3849_v50, %v4709_v38  ;;  %v1844_v46 = vpop.f32.mrb[65].mxu1 }
 0x521   : > { %v1845_v59 = vadd.f32 %v4709_v38, %v1844_v46  ;;  %v3850_v62 = vpop.f32.mrb[66].mxu1 }
 0x522   : > { %v1973_v47 = vadd.f32 %v1853_v57, %v4393_v61  ;;  %v1856_v0 = vadd.f32 %v3850_v62, %v4709_v38  ;;  %v1847_v7 = vpop.f32.mrb[67].mxu1 }
 0x523   : > { %v1971_v8 = vadd.f32 %v1845_v59, %v4380_v54  ;;  %v1848_v37 = vadd.f32 %v4709_v38, %v1847_v7 }
 0x524   : > { %v1974_v31 = vadd.f32 %v1856_v0, %v4390_v60  ;;  %v2005_v20 = vmax.f32 %v1973_v47, 0.0  ;;  %v5313_v0 = vld [vmem:[#allocation3_spill] sm:$0xff] }
 0x525   : > { %v1972_v42 = vadd.f32 %v1848_v37, %v4377_v53  ;;  %v2003_v52 = vmax.f32 %v1971_v8, 0.0 }
 0x526   : > { %v2006_v19 = vmax.f32 %v1974_v31, 0.0  ;;  %v5314_v31 = vld [vmem:[#allocation2_spill] sm:$0xff] }
 0x527   : > { %v2004_v34 = vmax.f32 %v1972_v42, 0.0 }
 0x528   : > { %v4855_v29 = vpack.c.bf16 %v2006_v19, %v2005_v20 }
 0x529   : > { %v4857_v23 = vpack.c.bf16 %v2004_v34, %v2003_v52 }
 0x52f   : > { %v3853_v9 = vpop.f32.mrb[68].mxu1 }
 0x530   : > { %v1869_v33 = vadd.f32 %v3853_v9, %v4709_v38  ;;  %v1860_v11 = vpop.f32.mrb[69].mxu1 }
 0x531   : > { %v1861_v45 = vadd.f32 %v4709_v38, %v1860_v11  ;;  %v3854_v36 = vpop.f32.mrb[70].mxu1 }
 0x532   : > { %v1977_v55 = vadd.f32 %v1869_v33, %v4426_v21  ;;  %v1872_v10 = vadd.f32 %v3854_v36, %v4709_v38  ;;  %v1863_v27 = vpop.f32.mrb[71].mxu1 }
 0x533   : > { %v1975_v13 = vadd.f32 %v1861_v45, %v4405_v5  ;;  %v1864_v41 = vadd.f32 %v4709_v38, %v1863_v27 }
 0x534   : > { %v1978_v35 = vadd.f32 %v1872_v10, %v4419_v17  ;;  %v2009_v12 = vmax.f32 %v1977_v55, 0.0 }
 0x535   : > { %v1976_v24 = vadd.f32 %v1864_v41, %v4399_v2  ;;  %v2007_v49 = vmax.f32 %v1975_v13, 0.0 }
 0x536   : > { %v2010_v15 = vmax.f32 %v1978_v35, 0.0  ;;  %v5315_v35 = vld [vmem:[#allocation5_spill] sm:$0xff] }
 0x537   : > { %v2008_v25 = vmax.f32 %v1976_v24, 0.0 }
 0x538   : > { %v4867_v44 = vpack.c.bf16 %v2010_v15, %v2009_v12 }
 0x539   : > { %v4869_v50 = vpack.c.bf16 %v2008_v25, %v2007_v49  ;;  %v5316_v49 = vld [vmem:[#allocation4_spill] sm:$0xff] }
 0x53f   : > { %v3857_v57 = vpop.f32.mrb[72].mxu1 }
 0x540   : > { %v1885_v46 = vadd.f32 %v3857_v57, %v4709_v38  ;;  %v1876_v59 = vpop.f32.mrb[73].mxu1 }
 0x541   : > { %v1877_v62 = vadd.f32 %v4709_v38, %v1876_v59  ;;  %v3858_v47 = vpop.f32.mrb[74].mxu1 }
 0x542   : > { %v1981_v7 = vadd.f32 %v1885_v46, %v5313_v0  ;;  %v1888_v8 = vadd.f32 %v3858_v47, %v4709_v38  ;;  %v1879_v37 = vpop.f32.mrb[75].mxu1 }
 0x543   : > { %v1979_v42 = vadd.f32 %v1877_v62, %v5314_v31  ;;  %v1880_v20 = vadd.f32 %v4709_v38, %v1879_v37 }
 0x544   : > { %v1982_v19 = vadd.f32 %v1888_v8, %v4447_v39  ;;  %v2013_v34 = vmax.f32 %v1981_v7, 0.0 }
 0x545   : > { %v1980_v52 = vadd.f32 %v1880_v20, %v4438_v32  ;;  %v2011_v33 = vmax.f32 %v1979_v42, 0.0 }
 0x546   : > { %v2014_v9 = vmax.f32 %v1982_v19, 0.0 }
 0x547   : > { %v2012_v11 = vmax.f32 %v1980_v52, 0.0 }
 0x548   : > { %v4879_v45 = vpack.c.bf16 %v2014_v9, %v2013_v34 }
 0x549   : > { %v4881_v36 = vpack.c.bf16 %v2012_v11, %v2011_v33 }
 0x54f   : > { %v3861_v55 = vpop.f32.mrb[76].mxu1 }
 0x550   : > { %v1901_v10 = vadd.f32 %v3861_v55, %v4709_v38  ;;  %v1892_v27 = vpop.f32.mrb[77].mxu1 }
 0x551   : > { %v1893_v13 = vadd.f32 %v4709_v38, %v1892_v27  ;;  %v3862_v41 = vpop.f32.mrb[78].mxu1 }
 0x552   : > { %v1985_v24 = vadd.f32 %v1901_v10, %v5315_v35  ;;  %v1904_v12 = vadd.f32 %v3862_v41, %v4709_v38  ;;  %v1895_v15 = vpop.f32.mrb[79].mxu1 }
 0x553   : > { %v1983_v25 = vadd.f32 %v1893_v13, %v5316_v49  ;;  %v1896_v57 = vadd.f32 %v4709_v38, %v1895_v15 }
 0x554   : > { %v1986_v46 = vadd.f32 %v1904_v12, %v4490_v22  ;;  %v2017_v62 = vmax.f32 %v1985_v24, 0.0 }
 0x555   : > { %v1984_v59 = vadd.f32 %v1896_v57, %v4469_v1  ;;  %v2015_v7 = vmax.f32 %v1983_v25, 0.0 }
 0x556   : > { %v2018_v47 = vmax.f32 %v1986_v46, 0.0 }
 0x557   : > { %v2016_v8 = vmax.f32 %v1984_v59, 0.0 }
 0x558   : > { %v4891_v37 = vpack.c.bf16 %v2018_v47, %v2017_v62 }
 0x559   : > { %v4893_v42 = vpack.c.bf16 %v2016_v8, %v2015_v7 }
 0x55f   : > { %v3865_v20 = vpop.f32.mrb[80].mxu1 }
 0x560   : > { %v1917_v19 = vadd.f32 %v3865_v20, %v4709_v38  ;;  %v1908_v52 = vpop.f32.mrb[81].mxu1 }
 0x561   : > { %v1909_v34 = vadd.f32 %v4709_v38, %v1908_v52  ;;  %v3866_v9 = vpop.f32.mrb[82].mxu1 }
 0x562   : > { %v1989_v33 = vadd.f32 %v1917_v19, %v4408_v6  ;;  %v1920_v11 = vadd.f32 %v3866_v9, %v4709_v38  ;;  %v1911_v55 = vpop.f32.mrb[83].mxu1 }
 0x563   : > { %v1987_v10 = vadd.f32 %v1909_v34, %v4386_v58  ;;  %v1912_v27 = vadd.f32 %v4709_v38, %v1911_v55 }
 0x564   : > { %v1990_v13 = vadd.f32 %v1920_v11, %v4402_v3  ;;  %v2021_v24 = vmax.f32 %v1989_v33, 0.0 }
 0x565   : > { %v1988_v41 = vadd.f32 %v1912_v27, %v4383_v56  ;;  %v2019_v15 = vmax.f32 %v1987_v10, 0.0 }
 0x566   : > { %v2022_v12 = vmax.f32 %v1990_v13, 0.0 }
 0x567   : > { %v2020_v25 = vmax.f32 %v1988_v41, 0.0 }
 0x568   : > { %v2044_v57 = vpack.c.bf16 %v2022_v12, %v2021_v24 }
 0x569   : > { %v2043_v46 = vpack.c.bf16 %v2020_v25, %v2019_v15 }
 0x56b   : > { %3515 = vmatprep.subr.bf16.mxu1 %v2043_v46 }
 0x56c   : > { %3516 = vmatpush3.bf16.msra.mxu1 %v4857_v23 }
 0x56d   : > { %3517 = vmatprep.subr.bf16.mxu1 %v2044_v57 }
 0x56f   : > { %v3869_v59 = vpop.f32.mrb[84].mxu1 }
 0x570   : > { %v1933_v62 = vadd.f32 %v3869_v59, %v4709_v38  ;;  %v1924_v47 = vpop.f32.mrb[85].mxu1  ;;  %3518 = vmatpush3.bf16.msra.mxu1 %v4855_v29 }
 0x571   : > { %v1925_v7 = vadd.f32 %v4709_v38, %v1924_v47  ;;  %v3870_v8 = vpop.f32.mrb[86].mxu1 }
 0x572   : > { %v1993_v20 = vadd.f32 %v1933_v62, %v4434_v28  ;;  %v1936_v19 = vadd.f32 %v3870_v8, %v4709_v38  ;;  %v1927_v52 = vpop.f32.mrb[87].mxu1 }
 0x573   : > { %v1991_v34 = vadd.f32 %v1925_v7, %v4422_v18  ;;  %v1928_v9 = vadd.f32 %v4709_v38, %v1927_v52 }
 0x574   : > { %v1994_v23 = vadd.f32 %v1936_v19, %v4431_v26  ;;  %v2025_v11 = vmax.f32 %v1993_v20, 0.0 }
 0x575   : > { %v1992_v33 = vadd.f32 %v1928_v9, %v4415_v14  ;;  %v2023_v10 = vmax.f32 %v1991_v34, 0.0 }
 0x576   : > { %v2026_v55 = vmax.f32 %v1994_v23, 0.0 }
 0x577   : > { %v2024_v29 = vmax.f32 %v1992_v33, 0.0 }
 0x578   : > { %v2046_v27 = vpack.c.bf16 %v2026_v55, %v2025_v11 }
 0x579   : > { %v2045_v13 = vpack.c.bf16 %v2024_v29, %v2023_v10 }
 0x57b   : > { %3519 = vmatprep.subr.bf16.mxu1 %v2045_v13 }
 0x57c   : > { %3520 = vmatpush3.bf16.msra.mxu1 %v4869_v50 }
 0x57d   : > { %3521 = vmatprep.subr.bf16.mxu1 %v2046_v27 }
 0x57f   : > { %v3873_v41 = vpop.f32.mrb[88].mxu1 }
 0x580   : > { %v1949_v24 = vadd.f32 %v3873_v41, %v4709_v38  ;;  %v1940_v12 = vpop.f32.mrb[89].mxu1  ;;  %3522 = vmatpush3.bf16.msra.mxu1 %v4867_v44 }
 0x581   : > { %v1941_v15 = vadd.f32 %v4709_v38, %v1940_v12  ;;  %v3874_v25 = vpop.f32.mrb[90].mxu1 }
 0x582   : > { %v1997_v57 = vadd.f32 %v1949_v24, %v4472_v4  ;;  %v1952_v46 = vadd.f32 %v3874_v25, %v4709_v38  ;;  %v1943_v59 = vpop.f32.mrb[91].mxu1 }
 0x583   : > { %v1995_v62 = vadd.f32 %v1941_v15, %v4457_v43  ;;  %v1944_v47 = vadd.f32 %v4709_v38, %v1943_v59  ;;  %v4154_v59 = vld [vmem:[%s4303_s20 + $0x14] ss:$8 sps:$4 sm:$0xff]  }
 0x584   : > { %v1998_v50 = vadd.f32 %v1952_v46, %v4464_v63  ;;  %v2029_v8 = vmax.f32 %v1997_v57, 0.0 }
 0x585   : > { %v1996_v7 = vadd.f32 %v1944_v47, %v4450_v40  ;;  %v2027_v19 = vmax.f32 %v1995_v62, 0.0  ;;  %v4155_v62 = vld [vmem:[%s4303_s20 + $0x10] ss:$8 sps:$4 sm:$0xff]   ;;  %v4156_v47 = vld [vmem:[%s4303_s20 + $0x24] ss:$8 sps:$4 sm:$0xff]  }
 0x586   : > { %v2030_v20 = vmax.f32 %v1998_v50, 0.0  ;;  %v4157_v50 = vld [vmem:[%s4303_s20 + $0x20] ss:$8 sps:$4 sm:$0xff]  }
 0x587   : > { %v2028_v44 = vmax.f32 %v1996_v7, 0.0  ;;  %v4159_v7 = vld [vmem:[%s4303_s20 + $0x30] ss:$8 sps:$4 sm:$0xff]  }
 0x588   : > { %v2048_v52 = vpack.c.bf16 %v2030_v20, %v2029_v8  ;;  %v4161_v8 = vld [vmem:[%s4303_s20 + $0x40] ss:$8 sps:$4 sm:$0xff]   ;;  %v4162_v20 = vld [vmem:[%s4303_s20 + $0x54] ss:$8 sps:$4 sm:$0xff]  }
 0x589   : > { %v2047_v34 = vpack.c.bf16 %v2028_v44, %v2027_v19  ;;  %v4163_v19 = vld [vmem:[%s4303_s20 + $0x50] ss:$8 sps:$4 sm:$0xff]   ;;  %v4164_v44 = vld [vmem:[%s4303_s20 + $0x64] ss:$8 sps:$4 sm:$0xff]  }
 0x58b   : > { %3523 = vmatprep.subr.bf16.mxu1 %v2047_v34  ;;  %v4166_v34 = vld [vmem:[%s4303_s20 + $0x74] ss:$8 sps:$4 sm:$0xff]  }
 0x58c   : > { %3524 = vmatpush3.bf16.msra.mxu1 %v4881_v36 }
 0x58d   : > { %3525 = vmatprep.subr.bf16.mxu1 %v2048_v52  ;;  %v4165_v52 = vld [vmem:[%s4303_s20 + $0x60] ss:$8 sps:$4 sm:$0xff]  }
 0x58f   : > { %v3877_v9 = vpop.f32.mrb[92].mxu1 }
 0x590   : > { %v1965_v23 = vadd.f32 %v3877_v9, %v4709_v38  ;;  %v1956_v33 = vpop.f32.mrb[93].mxu1  ;;  %3526 = vmatpush3.bf16.msra.mxu1 %v4879_v45  ;;  %v4167_v9 = vld [vmem:[%s4303_s20 + $0x70] ss:$8 sps:$4 sm:$0xff]  }
 0x591   : > { %v1957_v11 = vadd.f32 %v4709_v38, %v1956_v33  ;;  %v3878_v55 = vpop.f32.mrb[94].mxu1  ;;  %v4169_v33 = vld [vmem:[%s4303_s20 + $0x80] ss:$8 sps:$4 sm:$0xff]  }
 0x592   : > { %v2001_v10 = vadd.f32 %v1965_v23, %v4503_v51  ;;  %v1968_v29 = vadd.f32 %v3878_v55, %v4709_v38  ;;  %v1959_v27 = vpop.f32.mrb[95].mxu1  ;;  %v4168_v23 = vld [vmem:[%s4303_s20 + $0x84] ss:$8 sps:$4 sm:$0xff]   ;;  %v4171_v55 = vld [vmem:[%s4303_s20 + $0x90] ss:$8 sps:$4 sm:$0xff]  }
 0x593   : > { %v1999_v13 = vadd.f32 %v1957_v11, %v4485_v16  ;;  %v1960_v36 = vadd.f32 %v4709_v38, %v1959_v27  ;;  %v4153_v38 = vld [vmem:[%s4303_s20] ss:$8 sps:$4 sm:$0xff]   ;;  %v4170_v11 = vld [vmem:[%s4303_s20 + $0x94] ss:$8 sps:$4 sm:$0xff]  }
 0x594   : > { %v2002_v41 = vadd.f32 %v1968_v29, %v4500_v30  ;;  %v2033_v45 = vmax.f32 %v2001_v10, 0.0  ;;  %v4172_v10 = vld [vmem:[%s4303_s20 + $0xa4] ss:$8 sps:$4 sm:$0xff]   ;;  %v4173_v29 = vld [vmem:[%s4303_s20 + $0xa0] ss:$8 sps:$4 sm:$0xff]  }
 0x595   : > { %v2000_v24 = vadd.f32 %v1960_v36, %v4482_v48  ;;  %v2031_v15 = vmax.f32 %v1999_v13, 0.0  ;;  %v4174_v27 = vld [vmem:[%s4303_s20 + $0xb4] ss:$8 sps:$4 sm:$0xff]   ;;  %v4175_v13 = vld [vmem:[%s4303_s20 + $0xb0] ss:$8 sps:$4 sm:$0xff]  }
 0x596   : > { %v2034_v12 = vmax.f32 %v2002_v41, 0.0  ;;  %v4176_v36 = vld [vmem:[%s4303_s20 + $0xc4] ss:$8 sps:$4 sm:$0xff]   ;;  %v4177_v41 = vld [vmem:[%s4303_s20 + $0xc0] ss:$8 sps:$4 sm:$0xff]  }
 0x597   : > { %v2032_v25 = vmax.f32 %v2000_v24, 0.0  ;;  %v4178_v24 = vld [vmem:[%s4303_s20 + $0xd4] ss:$8 sps:$4 sm:$0xff]  }
 0x598   : > { %v2050_v57 = vpack.c.bf16 %v2034_v12, %v2033_v45  ;;  %v4179_v45 = vld [vmem:[%s4303_s20 + $0xd0] ss:$8 sps:$4 sm:$0xff]   ;;  %v4180_v12 = vld [vmem:[%s4303_s20 + $0xe4] ss:$8 sps:$4 sm:$0xff]  }
 0x599   : > { %v2049_v46 = vpack.c.bf16 %v2032_v25, %v2031_v15  ;;  %v4181_v15 = vld [vmem:[%s4303_s20 + $0xe0] ss:$8 sps:$4 sm:$0xff]   ;;  %v4182_v25 = vld [vmem:[%s4303_s20 + $0xf4] ss:$8 sps:$4 sm:$0xff]  }
 0x59b   : > { %3527 = vmatprep.subr.bf16.mxu1 %v2049_v46 }
 0x59c   : > { %3528 = vmatpush3.bf16.msra.mxu1 %v4893_v42  ;;  %v4158_v42 = vld [vmem:[%s4303_s20 + $0x34] ss:$8 sps:$4 sm:$0xff]  }
 0x59d   : > { %3529 = vmatprep.subr.bf16.mxu1 %v2050_v57  ;;  %v4183_v57 = vld [vmem:[%s4303_s20 + $0xf0] ss:$8 sps:$4 sm:$0xff]  }
 0x5a0   : > { %3530 = vmatpush3.bf16.msra.mxu1 %v4891_v37  ;;  %v4160_v37 = vld [vmem:[%s4303_s20 + $0x44] ss:$8 sps:$4 sm:$0xff]  }
 0x5a3   : > { %2084 = vmatmul.mubr.bf16.vlgmr.msra.gmra.mrb[96].mxu1 %v4153_v38  ;;  %v4120_v38 = vld [vmem:[%s5207_s7] sm:$0xff]  }
 0x5a4   : > { %2091 = vmatprep.mubr.bf16.mxu1 %v4154_v59  ;;  %3927 = vmatprep.subr.bf16.mxu0 %v4120_v38 }
 0x5ab   : > { %2092 = vmatmul.mubr.bf16.gmra.mrb[100].mxu1 %v4155_v62 }
 0x5ac   : > { %2099 = vmatprep.mubr.bf16.mxu1 %v4156_v47 }
 0x5b3   : > { %2100 = vmatmul.mubr.bf16.gmra.mrb[104].mxu1 %v4157_v50 }
 0x5b4   : > { %2107 = vmatprep.mubr.bf16.mxu1 %v4158_v42 }
 0x5bb   : > { %2108 = vmatmul.mubr.bf16.gmra.mrb[108].mxu1 %v4159_v7 }
 0x5bc   : > { %2115 = vmatprep.mubr.bf16.mxu1 %v4160_v37 }
 0x5c3   : > { %2116 = vmatmul.mubr.bf16.gmra.mrb[112].mxu1 %v4161_v8 }
 0x5c4   : > { %2123 = vmatprep.mubr.bf16.mxu1 %v4162_v20 }
 0x5cb   : > { %2124 = vmatmul.mubr.bf16.gmra.mrb[116].mxu1 %v4163_v19 }
 0x5cc   : > { %2131 = vmatprep.mubr.bf16.mxu1 %v4164_v44 }
 0x5d3   : > { %2132 = vmatmul.mubr.bf16.gmra.mrb[120].mxu1 %v4165_v52 }
 0x5d4   : > { %2139 = vmatprep.mubr.bf16.mxu1 %v4166_v34 }
 0x5db   : > { %2140 = vmatmul.mubr.bf16.gmra.mrb[124].mxu1 %v4167_v9  ;;  %v4121_v9 = vld [vmem:[%s5207_s7 + $0x8] sm:$0xff]  }
 0x5dc   : > { %2147 = vmatprep.mubr.bf16.mxu1 %v4168_v23 }
 0x5e3   : > { %2148 = vmatmul.mubr.bf16.gmra.mrb[128].mxu1 %v4169_v33 }
 0x5e4   : > { %2155 = vmatprep.mubr.bf16.mxu1 %v4170_v11 }
 0x5eb   : > { %2156 = vmatmul.mubr.bf16.gmra.mrb[132].mxu1 %v4171_v55 }
 0x5ec   : > { %2163 = vmatprep.mubr.bf16.mxu1 %v4172_v10  ;;  %v4122_v10 = vld [vmem:[%s5207_s7 + $0x10] sm:$0xff]  }
 0x5f3   : > { %2164 = vmatmul.mubr.bf16.gmra.mrb[136].mxu1 %v4173_v29 }
 0x5f4   : > { %2171 = vmatprep.mubr.bf16.mxu1 %v4174_v27 }
 0x5fb   : > { %2172 = vmatmul.mubr.bf16.gmra.mrb[140].mxu1 %v4175_v13 }
 0x5fc   : > { %2179 = vmatprep.mubr.bf16.mxu1 %v4176_v36  ;;  %v4123_v36 = vld [vmem:[%s5207_s7 + $0x18] sm:$0xff]  }
 0x603   : > { %2180 = vmatmul.mubr.bf16.gmra.mrb[144].mxu1 %v4177_v41 }
 0x604   : > { %2187 = vmatprep.mubr.bf16.mxu1 %v4178_v24 }
 0x60b   : > { %2188 = vmatmul.mubr.bf16.gmra.mrb[148].mxu1 %v4179_v45 }
 0x60c   : > { %2195 = vmatprep.mubr.bf16.mxu1 %v4180_v12 }
 0x613   : > { %2196 = vmatmul.mubr.bf16.gmra.mrb[152].mxu1 %v4181_v15  ;;  %v4124_v15 = vld [vmem:[%s5207_s7 + $0x20] sm:$0xff]  }
 0x614   : > { %2203 = vmatprep.mubr.bf16.mxu1 %v4182_v25 }
 0x61b   : > { %2204 = vmatmul.mubr.bf16.gmra.mrb[156].mxu1 %v4183_v57 }
 0x676   : > { %v3531_v46 = vpop.f32.mrb[96].mxu1 }
 0x677   : > { %v3532_v59 = vpop.f32.mrb[97].mxu1 }
 0x678   : > { %v3533_v62 = vadd.f32 %v3532_v59, %v3531_v46  ;;  %v3534_v47 = vpop.f32.mrb[98].mxu1 }
 0x679   : > { %v3535_v50 = vpop.f32.mrb[99].mxu1 }
 0x67a   : > { %v3536_v42 = vadd.f32 %v3535_v50, %v3534_v47 }
 0x67c   : > { %v2212_v7 = vpack.c.bf16 %v3536_v42, %v3533_v62 }
 0x67e   : > { %v3537_v37 = vpop.f32.mrb[100].mxu1  ;;  %3895 = vmatprep.mubr.bf16.mxu0 %v2212_v7 }
 0x67f   : > { %v3538_v8 = vpop.f32.mrb[101].mxu1 }
 0x680   : > { %v3539_v20 = vadd.f32 %v3538_v8, %v3537_v37  ;;  %v3540_v19 = vpop.f32.mrb[102].mxu1 }
 0x681   : > { %v3541_v44 = vpop.f32.mrb[103].mxu1 }
 0x682   : > { %v3542_v52 = vadd.f32 %v3541_v44, %v3540_v19 }
 0x684   : > { %v2213_v34 = vpack.c.bf16 %v3542_v52, %v3539_v20 }
 0x686   : > { %v3543_v23 = vpop.f32.mrb[104].mxu1  ;;  %3896 = vmatmul.mubr.bf16.vlgmr.msra.gmra.mrb[128].mxu0 %v2213_v34 }
 0x687   : > { %v3544_v33 = vpop.f32.mrb[105].mxu1  ;;  %3928 = vmatpush3.bf16.msra.mxu0 %v4120_v38 }
 0x688   : > { %v3545_v11 = vadd.f32 %v3544_v33, %v3543_v23  ;;  %v3546_v55 = vpop.f32.mrb[106].mxu1  ;;  %3929 = vmatprep.subr.bf16.mxu0 %v4121_v9 }
 0x689   : > { %v3547_v29 = vpop.f32.mrb[107].mxu1 }
 0x68a   : > { %v3548_v27 = vadd.f32 %v3547_v29, %v3546_v55 }
 0x68b   : > { %3930 = vmatpush3.bf16.msra.mxu0 %v4121_v9 }
 0x68c   : > { %v2214_v13 = vpack.c.bf16 %v3548_v27, %v3545_v11  ;;  %3931 = vmatprep.subr.bf16.mxu0 %v4122_v10 }
 0x68e   : > { %v3549_v41 = vpop.f32.mrb[108].mxu1  ;;  %3899 = vmatprep.mubr.bf16.mxu0 %v2214_v13 }
 0x68f   : > { %v3550_v24 = vpop.f32.mrb[109].mxu1  ;;  %3932 = vmatpush3.bf16.msra.mxu0 %v4122_v10 }
 0x690   : > { %v3551_v45 = vadd.f32 %v3550_v24, %v3549_v41  ;;  %v3552_v12 = vpop.f32.mrb[110].mxu1  ;;  %3933 = vmatprep.subr.bf16.mxu0 %v4123_v36 }
 0x691   : > { %v3553_v25 = vpop.f32.mrb[111].mxu1 }
 0x692   : > { %v3554_v57 = vadd.f32 %v3553_v25, %v3552_v12 }
 0x693   : > { %3934 = vmatpush3.bf16.msra.mxu0 %v4123_v36 }
 0x694   : > { %v2215_v46 = vpack.c.bf16 %v3554_v57, %v3551_v45  ;;  %3935 = vmatprep.subr.bf16.mxu0 %v4124_v15 }
 0x696   : > { %v3555_v38 = vpop.f32.mrb[112].mxu1  ;;  %3900 = vmatmul.mubr.bf16.gmra.mrb[132].mxu0 %v2215_v46 }
 0x697   : > { %v3556_v59 = vpop.f32.mrb[113].mxu1  ;;  %3936 = vmatpush3.bf16.msra.mxu0 %v4124_v15 }
 0x698   : > { %v3557_v62 = vadd.f32 %v3556_v59, %v3555_v38  ;;  %v3558_v47 = vpop.f32.mrb[114].mxu1 }
 0x699   : > { %v3559_v50 = vpop.f32.mrb[115].mxu1 }
 0x69a   : > { %v3560_v42 = vadd.f32 %v3559_v50, %v3558_v47 }
 0x69c   : > { %v2216_v7 = vpack.c.bf16 %v3560_v42, %v3557_v62 }
 0x69e   : > { %v3561_v37 = vpop.f32.mrb[116].mxu1  ;;  %3903 = vmatprep.mubr.bf16.mxu0 %v2216_v7 }
 0x69f   : > { %v3562_v8 = vpop.f32.mrb[117].mxu1 }
 0x6a0   : > { %v3563_v20 = vadd.f32 %v3562_v8, %v3561_v37  ;;  %v3564_v19 = vpop.f32.mrb[118].mxu1 }
 0x6a1   : > { %v3565_v44 = vpop.f32.mrb[119].mxu1 }
 0x6a2   : > { %v3566_v52 = vadd.f32 %v3565_v44, %v3564_v19 }
 0x6a4   : > { %v2217_v34 = vpack.c.bf16 %v3566_v52, %v3563_v20 }
 0x6a6   : > { %v3567_v9 = vpop.f32.mrb[120].mxu1  ;;  %3904 = vmatmul.mubr.bf16.gmra.mrb[136].mxu0 %v2217_v34 }
 0x6a7   : > { %v3568_v23 = vpop.f32.mrb[121].mxu1 }
 0x6a8   : > { %v3569_v33 = vadd.f32 %v3568_v23, %v3567_v9  ;;  %v3570_v11 = vpop.f32.mrb[122].mxu1 }
 0x6a9   : > { %v3571_v55 = vpop.f32.mrb[123].mxu1 }
 0x6aa   : > { %v3572_v10 = vadd.f32 %v3571_v55, %v3570_v11 }
 0x6ac   : > { %v2218_v29 = vpack.c.bf16 %v3572_v10, %v3569_v33 }
 0x6ae   : > { %v3573_v27 = vpop.f32.mrb[124].mxu1  ;;  %3907 = vmatprep.mubr.bf16.mxu0 %v2218_v29 }
 0x6af   : > { %v3574_v13 = vpop.f32.mrb[125].mxu1 }
 0x6b0   : > { %v3575_v36 = vadd.f32 %v3574_v13, %v3573_v27  ;;  %v3576_v41 = vpop.f32.mrb[126].mxu1 }
 0x6b1   : > { %v3577_v24 = vpop.f32.mrb[127].mxu1 }
 0x6b2   : > { %v3578_v45 = vadd.f32 %v3577_v24, %v3576_v41 }
 0x6b4   : > { %v2219_v12 = vpack.c.bf16 %v3578_v45, %v3575_v36 }
 0x6b6   : > { %v3579_v15 = vpop.f32.mrb[128].mxu1  ;;  %3908 = vmatmul.mubr.bf16.gmra.mrb[140].mxu0 %v2219_v12 }
 0x6b7   : > { %v3580_v25 = vpop.f32.mrb[129].mxu1 }
 0x6b8   : > { %v3581_v57 = vadd.f32 %v3580_v25, %v3579_v15  ;;  %v3582_v46 = vpop.f32.mrb[130].mxu1  ;;  %v4125_v15 = vld [vmem:[%s5207_s7 + $0x28] sm:$0xff]  }
 0x6b9   : > { %v3583_v38 = vpop.f32.mrb[131].mxu1  ;;  %3937 = vmatprep.subr.bf16.mxu0 %v4125_v15 }
 0x6ba   : > { %v3584_v59 = vadd.f32 %v3583_v38, %v3582_v46  ;;  %3938 = vmatpush3.bf16.msra.mxu0 %v4125_v15  ;;  %v4126_v38 = vld [vmem:[%s5207_s7 + $0x30] sm:$0xff]  }
 0x6bb   : > { %3939 = vmatprep.subr.bf16.mxu0 %v4126_v38 }
 0x6bc   : > { %v2220_v62 = vpack.c.bf16 %v3584_v59, %v3581_v57 }
 0x6be   : > { %v3585_v47 = vpop.f32.mrb[132].mxu1  ;;  %3911 = vmatprep.mubr.bf16.mxu0 %v2220_v62  ;;  %3940 = vmatpush3.bf16.msra.mxu0 %v4126_v38 }
 0x6bf   : > { %v3586_v50 = vpop.f32.mrb[133].mxu1 }
 0x6c0   : > { %v3587_v42 = vadd.f32 %v3586_v50, %v3585_v47  ;;  %v3588_v7 = vpop.f32.mrb[134].mxu1 }
 0x6c1   : > { %v3589_v37 = vpop.f32.mrb[135].mxu1 }
 0x6c2   : > { %v3590_v8 = vadd.f32 %v3589_v37, %v3588_v7 }
 0x6c4   : > { %v2221_v20 = vpack.c.bf16 %v3590_v8, %v3587_v42  ;;  %v4127_v42 = vld [vmem:[%s5207_s7 + $0x38] sm:$0xff]  }
 0x6c5   : > { %3941 = vmatprep.subr.bf16.mxu0 %v4127_v42 }
 0x6c6   : > { %3912 = vmatmul.mubr.bf16.gmra.mrb[144].mxu0 %v2221_v20  ;;  %v3591_v19 = vpop.f32.mrb[136].mxu1 }
 0x6c7   : > { %v3592_v44 = vpop.f32.mrb[137].mxu1  ;;  %3942 = vmatpush3.bf16.msra.mxu0 %v4127_v42 }
 0x6c8   : > { %v3593_v52 = vadd.f32 %v3592_v44, %v3591_v19  ;;  %v3594_v34 = vpop.f32.mrb[138].mxu1 }
 0x6c9   : > { %v3595_v9 = vpop.f32.mrb[139].mxu1 }
 0x6ca   : > { %v3596_v23 = vadd.f32 %v3595_v9, %v3594_v34 }
 0x6cc   : > { %v2222_v33 = vpack.c.bf16 %v3596_v23, %v3593_v52 }
 0x6ce   : > { %v3597_v11 = vpop.f32.mrb[140].mxu1  ;;  %3915 = vmatprep.mubr.bf16.mxu0 %v2222_v33 }
 0x6cf   : > { %v3598_v55 = vpop.f32.mrb[141].mxu1 }
 0x6d0   : > { %v3599_v10 = vadd.f32 %v3598_v55, %v3597_v11  ;;  %v3600_v29 = vpop.f32.mrb[142].mxu1 }
 0x6d1   : > { %v3601_v27 = vpop.f32.mrb[143].mxu1 }
 0x6d2   : > { %v3602_v13 = vadd.f32 %v3601_v27, %v3600_v29 }
 0x6d4   : > { %v2223_v36 = vpack.c.bf16 %v3602_v13, %v3599_v10 }
 0x6d6   : > { %3916 = vmatmul.mubr.bf16.gmra.mrb[148].mxu0 %v2223_v36  ;;  %v3603_v41 = vpop.f32.mrb[144].mxu1 }
 0x6d7   : > { %v3604_v24 = vpop.f32.mrb[145].mxu1 }
 0x6d8   : > { %v3605_v45 = vadd.f32 %v3604_v24, %v3603_v41  ;;  %v3606_v12 = vpop.f32.mrb[146].mxu1  ;;  %v4993_v41 = vld [vmem:[%s5206_s6] ss:$0 sm:$0xff] }
 0x6d9   : > { %v3607_v25 = vpop.f32.mrb[147].mxu1 }
 0x6da   : > { %v3608_v57 = vadd.f32 %v3607_v25, %v3606_v12 }
 0x6dc   : > { %v2224_v46 = vpack.c.bf16 %v3608_v57, %v3605_v45 }
 0x6de   : > { %v3609_v59 = vpop.f32.mrb[148].mxu1  ;;  %3919 = vmatprep.mubr.bf16.mxu0 %v2224_v46 }
 0x6df   : > { %v3610_v62 = vpop.f32.mrb[149].mxu1 }
 0x6e0   : > { %v3611_v47 = vadd.f32 %v3610_v62, %v3609_v59  ;;  %v3612_v50 = vpop.f32.mrb[150].mxu1 }
 0x6e1   : > { %v3613_v7 = vpop.f32.mrb[151].mxu1 }
 0x6e2   : > { %v3614_v37 = vadd.f32 %v3613_v7, %v3612_v50 }
 0x6e4   : > { %v2225_v8 = vpack.c.bf16 %v3614_v37, %v3611_v47 }
 0x6e6   : > { %3920 = vmatmul.mubr.bf16.gmra.mrb[152].mxu0 %v2225_v8  ;;  %v3615_v20 = vpop.f32.mrb[152].mxu1 }
 0x6e7   : > { %v3616_v19 = vpop.f32.mrb[153].mxu1 }
 0x6e8   : > { %v3617_v44 = vadd.f32 %v3616_v19, %v3615_v20  ;;  %v3618_v52 = vpop.f32.mrb[154].mxu1 }
 0x6e9   : > { %v3619_v34 = vpop.f32.mrb[155].mxu1 }
 0x6ea   : > { %v3620_v9 = vadd.f32 %v3619_v34, %v3618_v52 }
 0x6ec   : > { %v2226_v23 = vpack.c.bf16 %v3620_v9, %v3617_v44 }
 0x6ee   : > { %v3621_v33 = vpop.f32.mrb[156].mxu1  ;;  %3923 = vmatprep.mubr.bf16.mxu0 %v2226_v23 }
 0x6ef   : > { %v3622_v11 = vpop.f32.mrb[157].mxu1 }
 0x6f0   : > { %v3623_v55 = vadd.f32 %v3622_v11, %v3621_v33  ;;  %v3624_v10 = vpop.f32.mrb[158].mxu1 }
 0x6f1   : > { %v3625_v29 = vpop.f32.mrb[159].mxu1 }
 0x6f2   : > { %v3626_v27 = vadd.f32 %v3625_v29, %v3624_v10 }
 0x6f4   : > { %v2227_v13 = vpack.c.bf16 %v3626_v27, %v3623_v55 }
 0x6f6   : > { %3924 = vmatmul.mubr.bf16.gmra.mrb[156].mxu0 %v2227_v13 }
 0x759   : > { %v3897_v36 = vpop.f32.mrb[128].mxu0 }
 0x75a   : > { %v2271_v24 = vadd.f32 %v4993_v41, %v3897_v36  ;;  %v2262_v45 = vpop.f32.mrb[129].mxu0 }
 0x75b   : > { %v2263_v12 = vadd.f32 %v4993_v41, %v2262_v45  ;;  %v3898_v15 = vpop.f32.mrb[130].mxu0 }
 0x75c   : > { %v2391_v25 = vadd.f32 %v2271_v24, %v4393_v61  ;;  %v2274_v57 = vadd.f32 %v4993_v41, %v3898_v15  ;;  %v2265_v46 = vpop.f32.mrb[131].mxu0 }
 0x75d   : > { %v2389_v38 = vadd.f32 %v2263_v12, %v4380_v54  ;;  %v2266_v59 = vadd.f32 %v4993_v41, %v2265_v46 }
 0x75e   : > { %v2392_v62 = vadd.f32 %v2274_v57, %v4390_v60  ;;  %v2423_v50 = vmax.f32 %v2391_v25, 0.0 }
 0x75f   : > { %v2390_v47 = vadd.f32 %v2266_v59, %v4377_v53  ;;  %v2421_v7 = vmax.f32 %v2389_v38, 0.0 }
 0x760   : > { %v2424_v42 = vmax.f32 %v2392_v62, 0.0 }
 0x761   : > { %v2422_v37 = vmax.f32 %v2390_v47, 0.0 }
 0x762   : > { %v2454_v8 = vpack.c.bf16 %v2424_v42, %v2423_v50 }
 0x763   : > { %v2453_v20 = vpack.c.bf16 %v2422_v37, %v2421_v7 }
 0x765   : > { %3943 = vmatprep.mubr.bf16.mxu0 %v2453_v20 }
 0x766   : > { %3944 = vmatmul.mubr.bf16.vlgmr.msra.gmra.mrb[160].mxu0 %v2454_v8 }
 0x769   : > { %v3901_v61 = vpop.f32.mrb[132].mxu0 }
 0x76a   : > { %v2287_v19 = vadd.f32 %v4993_v41, %v3901_v61  ;;  %v2278_v44 = vpop.f32.mrb[133].mxu0 }
 0x76b   : > { %v2279_v54 = vadd.f32 %v4993_v41, %v2278_v44  ;;  %v3902_v52 = vpop.f32.mrb[134].mxu0 }
 0x76c   : > { %v2395_v34 = vadd.f32 %v2287_v19, %v4426_v21  ;;  %v2290_v60 = vadd.f32 %v4993_v41, %v3902_v52  ;;  %v2281_v53 = vpop.f32.mrb[135].mxu0 }
 0x76d   : > { %v2393_v9 = vadd.f32 %v2279_v54, %v4405_v5  ;;  %v2282_v23 = vadd.f32 %v4993_v41, %v2281_v53 }
 0x76e   : > { %v2396_v33 = vadd.f32 %v2290_v60, %v4419_v17  ;;  %v2427_v55 = vmax.f32 %v2395_v34, 0.0 }
 0x76f   : > { %v2394_v11 = vadd.f32 %v2282_v23, %v4399_v2  ;;  %v2425_v29 = vmax.f32 %v2393_v9, 0.0 }
 0x770   : > { %v2428_v10 = vmax.f32 %v2396_v33, 0.0 }
 0x771   : > { %v2426_v27 = vmax.f32 %v2394_v11, 0.0 }
 0x772   : > { %v2456_v13 = vpack.c.bf16 %v2428_v10, %v2427_v55 }
 0x773   : > { %v2455_v36 = vpack.c.bf16 %v2426_v27, %v2425_v29 }
 0x775   : > { %3947 = vmatprep.mubr.bf16.mxu0 %v2455_v36 }
 0x776   : > { %3948 = vmatmul.mubr.bf16.gmra.mrb[164].mxu0 %v2456_v13 }
 0x779   : > { %v3905_v21 = vpop.f32.mrb[136].mxu0 }
 0x77a   : > { %v2303_v24 = vadd.f32 %v4993_v41, %v3905_v21  ;;  %v2294_v45 = vpop.f32.mrb[137].mxu0 }
 0x77b   : > { %v2295_v5 = vadd.f32 %v4993_v41, %v2294_v45  ;;  %v3906_v12 = vpop.f32.mrb[138].mxu0 }
 0x77c   : > { %v2399_v15 = vadd.f32 %v2303_v24, %v5313_v0  ;;  %v2306_v17 = vadd.f32 %v4993_v41, %v3906_v12  ;;  %v2297_v2 = vpop.f32.mrb[139].mxu0 }
 0x77d   : > { %v2397_v25 = vadd.f32 %v2295_v5, %v5314_v31  ;;  %v2298_v57 = vadd.f32 %v4993_v41, %v2297_v2 }
 0x77e   : > { %v2400_v46 = vadd.f32 %v2306_v17, %v4447_v39  ;;  %v2431_v59 = vmax.f32 %v2399_v15, 0.0 }
 0x77f   : > { %v2398_v38 = vadd.f32 %v2298_v57, %v4438_v32  ;;  %v2429_v47 = vmax.f32 %v2397_v25, 0.0 }
 0x780   : > { %v2432_v62 = vmax.f32 %v2400_v46, 0.0 }
 0x781   : > { %v2430_v50 = vmax.f32 %v2398_v38, 0.0 }
 0x782   : > { %v2458_v42 = vpack.c.bf16 %v2432_v62, %v2431_v59 }
 0x783   : > { %v2457_v7 = vpack.c.bf16 %v2430_v50, %v2429_v47 }
 0x785   : > { %3951 = vmatprep.mubr.bf16.mxu0 %v2457_v7 }
 0x786   : > { %3952 = vmatmul.mubr.bf16.gmra.mrb[168].mxu0 %v2458_v42 }
 0x789   : > { %v3909_v0 = vpop.f32.mrb[140].mxu0 }
 0x78a   : > { %v2319_v37 = vadd.f32 %v4993_v41, %v3909_v0  ;;  %v2310_v8 = vpop.f32.mrb[141].mxu0 }
 0x78b   : > { %v2311_v31 = vadd.f32 %v4993_v41, %v2310_v8  ;;  %v3910_v20 = vpop.f32.mrb[142].mxu0 }
 0x78c   : > { %v2403_v61 = vadd.f32 %v2319_v37, %v5315_v35  ;;  %v2322_v39 = vadd.f32 %v4993_v41, %v3910_v20  ;;  %v2313_v32 = vpop.f32.mrb[143].mxu0 }
 0x78d   : > { %v2401_v19 = vadd.f32 %v2311_v31, %v5316_v49  ;;  %v2314_v44 = vadd.f32 %v4993_v41, %v2313_v32 }
 0x78e   : > { %v2404_v54 = vadd.f32 %v2322_v39, %v4490_v22  ;;  %v2435_v34 = vmax.f32 %v2403_v61, 0.0 }
 0x78f   : > { %v2402_v52 = vadd.f32 %v2314_v44, %v4469_v1  ;;  %v2433_v53 = vmax.f32 %v2401_v19, 0.0 }
 0x790   : > { %v2436_v60 = vmax.f32 %v2404_v54, 0.0 }
 0x791   : > { %v2434_v9 = vmax.f32 %v2402_v52, 0.0 }
 0x792   : > { %v2460_v23 = vpack.c.bf16 %v2436_v60, %v2435_v34 }
 0x793   : > { %v2459_v33 = vpack.c.bf16 %v2434_v9, %v2433_v53 }
 0x795   : > { %3955 = vmatprep.mubr.bf16.mxu0 %v2459_v33 }
 0x796   : > { %3956 = vmatmul.mubr.bf16.gmra.mrb[172].mxu0 %v2460_v23 }
 0x799   : > { %v3913_v35 = vpop.f32.mrb[144].mxu0 }
 0x79a   : > { %v2335_v11 = vadd.f32 %v4993_v41, %v3913_v35  ;;  %v2326_v55 = vpop.f32.mrb[145].mxu0 }
 0x79b   : > { %v2327_v49 = vadd.f32 %v4993_v41, %v2326_v55  ;;  %v3914_v10 = vpop.f32.mrb[146].mxu0 }
 0x79c   : > { %v2407_v29 = vadd.f32 %v2335_v11, %v4408_v6  ;;  %v2338_v22 = vadd.f32 %v4993_v41, %v3914_v10  ;;  %v2329_v1 = vpop.f32.mrb[147].mxu0 }
 0x79d   : > { %v2405_v27 = vadd.f32 %v2327_v49, %v4386_v58  ;;  %v2330_v13 = vadd.f32 %v4993_v41, %v2329_v1 }
 0x79e   : > { %v2408_v36 = vadd.f32 %v2338_v22, %v4402_v3  ;;  %v2439_v24 = vmax.f32 %v2407_v29, 0.0 }
 0x79f   : > { %v2406_v21 = vadd.f32 %v2330_v13, %v4383_v56  ;;  %v2437_v5 = vmax.f32 %v2405_v27, 0.0 }
 0x7a0   : > { %v2440_v45 = vmax.f32 %v2408_v36, 0.0 }
 0x7a1   : > { %v2438_v12 = vmax.f32 %v2406_v21, 0.0 }
 0x7a2   : > { %v2462_v15 = vpack.c.bf16 %v2440_v45, %v2439_v24 }
 0x7a3   : > { %v2461_v17 = vpack.c.bf16 %v2438_v12, %v2437_v5 }
 0x7a5   : > { %3959 = vmatprep.mubr.bf16.mxu0 %v2461_v17 }
 0x7a6   : > { %3960 = vmatmul.mubr.bf16.gmra.mrb[176].mxu0 %v2462_v15 }
 0x7a9   : > { %v3917_v6 = vpop.f32.mrb[148].mxu0 }
 0x7aa   : > { %v2351_v2 = vadd.f32 %v4993_v41, %v3917_v6  ;;  %v2342_v25 = vpop.f32.mrb[149].mxu0 }
 0x7ab   : > { %v2343_v58 = vadd.f32 %v4993_v41, %v2342_v25  ;;  %v3918_v57 = vpop.f32.mrb[150].mxu0 }
 0x7ac   : > { %v2411_v46 = vadd.f32 %v2351_v2, %v4434_v28  ;;  %v2354_v3 = vadd.f32 %v4993_v41, %v3918_v57  ;;  %v2345_v56 = vpop.f32.mrb[151].mxu0 }
 0x7ad   : > { %v2409_v38 = vadd.f32 %v2343_v58, %v4422_v18  ;;  %v2346_v59 = vadd.f32 %v4993_v41, %v2345_v56 }
 0x7ae   : > { %v2412_v62 = vadd.f32 %v2354_v3, %v4431_v26  ;;  %v2443_v50 = vmax.f32 %v2411_v46, 0.0  ;;  %v4194_v46 = vmov 0.0  }
 0x7af   : > { %v2410_v47 = vadd.f32 %v2346_v59, %v4415_v14  ;;  %v2441_v7 = vmax.f32 %v2409_v38, 0.0  ;;  %3995 = vmatprep.subr.bf16.mxu0 %v4194_v46 }
 0x7b0   : > { %v2444_v42 = vmax.f32 %v2412_v62, 0.0 }
 0x7b1   : > { %v2442_v0 = vmax.f32 %v2410_v47, 0.0 }
 0x7b2   : > { %v2464_v37 = vpack.c.bf16 %v2444_v42, %v2443_v50 }
 0x7b3   : > { %v2463_v8 = vpack.c.bf16 %v2442_v0, %v2441_v7 }
 0x7b5   : > { %3963 = vmatprep.mubr.bf16.mxu0 %v2463_v8 }
 0x7b6   : > { %3964 = vmatmul.mubr.bf16.gmra.mrb[180].mxu0 %v2464_v37 }
 0x7b9   : > { %v3921_v28 = vpop.f32.mrb[152].mxu0 }
 0x7ba   : > { %v2367_v31 = vadd.f32 %v4993_v41, %v3921_v28  ;;  %v2358_v20 = vpop.f32.mrb[153].mxu0 }
 0x7bb   : > { %v2359_v18 = vadd.f32 %v4993_v41, %v2358_v20  ;;  %v3922_v61 = vpop.f32.mrb[154].mxu0 }
 0x7bc   : > { %v2415_v39 = vadd.f32 %v2367_v31, %v4472_v4  ;;  %v2370_v26 = vadd.f32 %v4993_v41, %v3922_v61  ;;  %v2361_v14 = vpop.f32.mrb[155].mxu0 }
 0x7bd   : > { %v2413_v32 = vadd.f32 %v2359_v18, %v4457_v43  ;;  %v2362_v19 = vadd.f32 %v4993_v41, %v2361_v14 }
 0x7be   : > { %v2416_v44 = vadd.f32 %v2370_v26, %v4464_v63  ;;  %v2447_v52 = vmax.f32 %v2415_v39, 0.0 }
 0x7bf   : > { %v2414_v54 = vadd.f32 %v2362_v19, %v4450_v40  ;;  %v2445_v60 = vmax.f32 %v2413_v32, 0.0 }
 0x7c0   : > { %v2448_v34 = vmax.f32 %v2416_v44, 0.0 }
 0x7c1   : > { %v2446_v53 = vmax.f32 %v2414_v54, 0.0 }
 0x7c2   : > { %v2466_v9 = vpack.c.bf16 %v2448_v34, %v2447_v52 }
 0x7c3   : > { %v2465_v23 = vpack.c.bf16 %v2446_v53, %v2445_v60 }
 0x7c5   : > { %3967 = vmatprep.mubr.bf16.mxu0 %v2465_v23 }
 0x7c6   : > { %3968 = vmatmul.mubr.bf16.gmra.mrb[184].mxu0 %v2466_v9 }
 0x7c9   : > { %v3925_v4 = vpop.f32.mrb[156].mxu0 }
 0x7ca   : > { %v2383_v33 = vadd.f32 %v4993_v41, %v3925_v4  ;;  %v2374_v35 = vpop.f32.mrb[157].mxu0 }
 0x7cb   : > { %v2375_v43 = vadd.f32 %v4993_v41, %v2374_v35  ;;  %v3926_v11 = vpop.f32.mrb[158].mxu0 }
 0x7cc   : > { %v2419_v55 = vadd.f32 %v2383_v33, %v4503_v51  ;;  %v2386_v40 = vadd.f32 %v4993_v41, %v3926_v11  ;;  %v2377_v63 = vpop.f32.mrb[159].mxu0  ;;  %v5062_v51 = vld [vmem:[%s5208_s8] ss:$0 sm:$0xff] }
 0x7cd   : > { %v2417_v49 = vadd.f32 %v2375_v43, %v4485_v16  ;;  %v2378_v10 = vadd.f32 %v4993_v41, %v2377_v63  ;;  %v547_v16 = vld [vmem:[%s5068_s19 + $0x8] sm:$0xff] }
 0x7ce   : > { %v2420_v29 = vadd.f32 %v2386_v40, %v4500_v30  ;;  %v2451_v1 = vmax.f32 %v2419_v55, 0.0  ;;  %2780 = vmatprep.mubr.f32.mxu1 %v547_v16 }
 0x7cf   : > { %v2418_v22 = vadd.f32 %v2378_v10, %v4482_v48  ;;  %v2449_v13 = vmax.f32 %v2417_v49, 0.0 }
 0x7d0   : > { %v2452_v27 = vmax.f32 %v2420_v29, 0.0 }
 0x7d1   : > { %v2450_v36 = vmax.f32 %v2418_v22, 0.0 }
 0x7d2   : > { %v2468_v21 = vpack.c.bf16 %v2452_v27, %v2451_v1 }
 0x7d3   : > { %v2467_v24 = vpack.c.bf16 %v2450_v36, %v2449_v13 }
 0x7d5   : > { %3971 = vmatprep.mubr.bf16.mxu0 %v2467_v24 }
 0x7d6   : > { %3972 = vmatmul.mubr.bf16.gmra.mrb[188].mxu0 %v2468_v21 }
 0x7d7   : > { %4011 = vmatprep.mubr.msk.bf16.mxu0 %vm4195_vm4, %v4194_v46 }
 0x839   : > { %v3945_v48 = vpop.f32.mrb[160].mxu0 }
 0x83a   : > { %v2566_v30 = vadd.f32 %v3945_v48, %v5062_v51  ;;  %v2557_v41 = vpop.f32.mrb[161].mxu0 }
 0x83b   : > { %v2558_v45 = vadd.f32 %v5062_v51, %v2557_v41  ;;  %v3946_v5 = vpop.f32.mrb[162].mxu0 }
 0x83c   : > { %v2569_v12 = vadd.f32 %v3946_v5, %v5062_v51  ;;  %v2560_v15 = vpop.f32.mrb[163].mxu0  ;;  %v2686_v6 = vmax.f32 %v2566_v30, 0.0 }
 0x83d   : > { %v2561_v17 = vadd.f32 %v5062_v51, %v2560_v15  ;;  %v2684_v25 = vmax.f32 %v2558_v45, 0.0 }
 0x83e   : > { %v2687_v2 = vmax.f32 %v2569_v12, 0.0 }
 0x83f   : > { %v2685_v58 = vmax.f32 %v2561_v17, 0.0 }
 0x840   : > { %v4027_v57 = vpack.c.bf16 %v2687_v2, %v2686_v6 }
 0x841   : > { %v4023_v3 = vpack.c.bf16 %v2685_v58, %v2684_v25 }
 0x849   : > { %v3949_v56 = vpop.f32.mrb[164].mxu0 }
 0x84a   : > { %v2582_v38 = vadd.f32 %v3949_v56, %v5062_v51  ;;  %v2573_v59 = vpop.f32.mrb[165].mxu0 }
 0x84b   : > { %v2574_v62 = vadd.f32 %v5062_v51, %v2573_v59  ;;  %v3950_v47 = vpop.f32.mrb[166].mxu0 }
 0x84c   : > { %v2585_v50 = vadd.f32 %v3950_v47, %v5062_v51  ;;  %v2576_v42 = vpop.f32.mrb[167].mxu0  ;;  %v2690_v0 = vmax.f32 %v2582_v38, 0.0 }
 0x84d   : > { %v2577_v7 = vadd.f32 %v5062_v51, %v2576_v42  ;;  %v2688_v8 = vmax.f32 %v2574_v62, 0.0 }
 0x84e   : > { %v2691_v37 = vmax.f32 %v2585_v50, 0.0 }
 0x84f   : > { %v2689_v28 = vmax.f32 %v2577_v7, 0.0 }
 0x850   : > { %v5080_v31 = vpack.c.bf16 %v2691_v37, %v2690_v0 }
 0x851   : > { %v4031_v20 = vpack.c.bf16 %v2689_v28, %v2688_v8 }
 0x859   : > { %v3953_v18 = vpop.f32.mrb[168].mxu0 }
 0x85a   : > { %v2598_v61 = vadd.f32 %v3953_v18, %v5062_v51  ;;  %v2589_v39 = vpop.f32.mrb[169].mxu0 }
 0x85b   : > { %v2590_v26 = vadd.f32 %v5062_v51, %v2589_v39  ;;  %v3954_v14 = vpop.f32.mrb[170].mxu0 }
 0x85c   : > { %v2601_v32 = vadd.f32 %v3954_v14, %v5062_v51  ;;  %v2592_v19 = vpop.f32.mrb[171].mxu0  ;;  %v2694_v54 = vmax.f32 %v2598_v61, 0.0 }
 0x85d   : > { %v2593_v44 = vadd.f32 %v5062_v51, %v2592_v19  ;;  %v2692_v34 = vmax.f32 %v2590_v26, 0.0 }
 0x85e   : > { %v2695_v52 = vmax.f32 %v2601_v32, 0.0 }
 0x85f   : > { %v2693_v60 = vmax.f32 %v2593_v44, 0.0 }
 0x860   : > { %v5086_v53 = vpack.c.bf16 %v2695_v52, %v2694_v54 }
 0x861   : > { %v5088_v9 = vpack.c.bf16 %v2693_v60, %v2692_v34 }
 0x869   : > { %v3957_v23 = vpop.f32.mrb[172].mxu0 }
 0x86a   : > { %v2614_v4 = vadd.f32 %v3957_v23, %v5062_v51  ;;  %v2605_v33 = vpop.f32.mrb[173].mxu0 }
 0x86b   : > { %v2606_v35 = vadd.f32 %v5062_v51, %v2605_v33  ;;  %v3958_v43 = vpop.f32.mrb[174].mxu0 }
 0x86c   : > { %v2617_v11 = vadd.f32 %v3958_v43, %v5062_v51  ;;  %v2608_v55 = vpop.f32.mrb[175].mxu0  ;;  %v2698_v63 = vmax.f32 %v2614_v4, 0.0 }
 0x86d   : > { %v2609_v40 = vadd.f32 %v5062_v51, %v2608_v55  ;;  %v2696_v10 = vmax.f32 %v2606_v35, 0.0 }
 0x86e   : > { %v2699_v49 = vmax.f32 %v2617_v11, 0.0 }
 0x86f   : > { %v2697_v29 = vmax.f32 %v2609_v40, 0.0 }
 0x870   : > { %v5094_v22 = vpack.c.bf16 %v2699_v49, %v2698_v63  ;;  %v546_v63 = vld [vmem:[%s5068_s19] sm:$0xff] }
 0x871   : > { %v5096_v1 = vpack.c.bf16 %v2697_v29, %v2696_v10  ;;  %v4128_v49 = vld [vmem:[%s5209_s9] sm:$0xff]   ;;  %v549_v10 = vld [vmem:[%s5068_s19 + $0x18] sm:$0xff]  ;;  %v4129_v29 = vld [vmem:[%s5209_s9 + $0x8] sm:$0xff]  }
 0x879   : > { %v3961_v27 = vpop.f32.mrb[176].mxu0 }
 0x87a   : > { %v2630_v13 = vadd.f32 %v3961_v27, %v5062_v51  ;;  %v2621_v36 = vpop.f32.mrb[177].mxu0  ;;  %v4132_v27 = vld [vmem:[%s5209_s9 + $0x20] sm:$0xff]  }
 0x87b   : > { %v2622_v21 = vadd.f32 %v5062_v51, %v2621_v36  ;;  %v3962_v24 = vpop.f32.mrb[178].mxu0  ;;  %v4134_v36 = vld [vmem:[%s5209_s9 + $0x30] sm:$0xff]  }
 0x87c   : > { %v2633_v48 = vadd.f32 %v3962_v24, %v5062_v51  ;;  %v2624_v16 = vpop.f32.mrb[179].mxu0  ;;  %v2702_v41 = vmax.f32 %v2630_v13, 0.0  ;;  %v4133_v13 = vld [vmem:[%s5209_s9 + $0x28] sm:$0xff]   ;;  %v4136_v24 = vld [vmem:[%s5211_s11] sm:$0xff]  }
 0x87d   : > { %v2625_v30 = vadd.f32 %v5062_v51, %v2624_v16  ;;  %v2700_v5 = vmax.f32 %v2622_v21, 0.0  ;;  %v4135_v21 = vld [vmem:[%s5209_s9 + $0x38] sm:$0xff]   ;;  %3996 = vmatpush3.bf16.msra.mxu0 %v4136_v24  ;;  %v4138_v16 = vld [vmem:[%s5211_s11 + $0x10] sm:$0xff]  }
 0x87e   : > { %v2703_v45 = vmax.f32 %v2633_v48, 0.0  ;;  %v4137_v48 = vld [vmem:[%s5211_s11 + $0x8] sm:$0xff]   ;;  %3997 = vmatprep.subr.bf16.mxu0 %v4194_v46 }
 0x87f   : > { %v2701_v12 = vmax.f32 %v2625_v30, 0.0  ;;  %v4139_v30 = vld [vmem:[%s5211_s11 + $0x18] sm:$0xff]  }
 0x880   : > { %v4025_v15 = vpack.c.bf16 %v2703_v45, %v2702_v41  ;;  %v4140_v41 = vld [vmem:[%s5211_s11 + $0x20] sm:$0xff]   ;;  %v4141_v45 = vld [vmem:[%s5211_s11 + $0x28] sm:$0xff]  }
 0x881   : > { %v4021_v17 = vpack.c.bf16 %v2701_v12, %v2700_v5  ;;  %3998 = vmatpush3.bf16.msra.mxu0 %v4137_v48 }
 0x882   : > { %3999 = vmatprep.subr.bf16.mxu0 %v4194_v46 }
 0x883   : > { %4022 = vmatprep.subr.bf16.mxu1 %v4021_v17 }
 0x884   : > { %4024 = vmatpush3.bf16.msra.mxu1 %v4023_v3 }
 0x885   : > { %4026 = vmatprep.subr.bf16.mxu1 %v4025_v15  ;;  %4000 = vmatpush3.bf16.msra.mxu0 %v4138_v16 }
 0x886   : > { %4001 = vmatprep.subr.bf16.mxu0 %v4194_v46 }
 0x888   : > { %4028 = vmatpush3.bf16.msra.mxu1 %v4027_v57 }
 0x889   : > { %v3965_v6 = vpop.f32.mrb[180].mxu0  ;;  %4002 = vmatpush3.bf16.msra.mxu0 %v4139_v30 }
 0x88a   : > { %v2646_v2 = vadd.f32 %v3965_v6, %v5062_v51  ;;  %v2637_v25 = vpop.f32.mrb[181].mxu0  ;;  %4003 = vmatprep.subr.bf16.mxu0 %v4194_v46 }
 0x88b   : > { %v2638_v58 = vadd.f32 %v5062_v51, %v2637_v25  ;;  %v3966_v56 = vpop.f32.mrb[182].mxu0 }
 0x88c   : > { %v2649_v38 = vadd.f32 %v3966_v56, %v5062_v51  ;;  %v2640_v59 = vpop.f32.mrb[183].mxu0  ;;  %v2706_v47 = vmax.f32 %v2646_v2, 0.0  ;;  %v4143_v56 = vld [vmem:[%s5211_s11 + $0x38] sm:$0xff]  }
 0x88d   : > { %v2641_v62 = vadd.f32 %v5062_v51, %v2640_v59  ;;  %v2704_v42 = vmax.f32 %v2638_v58, 0.0  ;;  %4004 = vmatpush3.bf16.msra.mxu0 %v4140_v41  ;;  %v4142_v58 = vld [vmem:[%s5211_s11 + $0x30] sm:$0xff]  }
 0x88e   : > { %v2707_v50 = vmax.f32 %v2649_v38, 0.0  ;;  %4005 = vmatprep.subr.bf16.mxu0 %v4194_v46  ;;  %v3185_v38 = vld [vmem:[%s5210_s10] ss:$0 sm:$0xff] }
 0x88f   : > { %v2705_v7 = vmax.f32 %v2641_v62, 0.0 }
 0x890   : > { %v4033_v0 = vpack.c.bf16 %v2707_v50, %v2706_v47 }
 0x891   : > { %v4029_v3 = vpack.c.bf16 %v2705_v7, %v2704_v42  ;;  %4006 = vmatpush3.bf16.msra.mxu0 %v4141_v45 }
 0x892   : > { %4007 = vmatprep.subr.bf16.mxu0 %v4194_v46 }
 0x893   : > { %4030 = vmatprep.subr.bf16.mxu1 %v4029_v3 }
 0x894   : > { %4032 = vmatpush3.bf16.msra.mxu1 %v4031_v20 }
 0x895   : > { %4034 = vmatprep.subr.bf16.mxu1 %v4033_v0  ;;  %4008 = vmatpush3.bf16.msra.mxu0 %v4142_v58 }
 0x896   : > { %4009 = vmatprep.subr.bf16.mxu0 %v4194_v46 }
 0x898   : > { %4036 = vmatpush3.bf16.msra.mxu1 %v5080_v31 }
 0x899   : > { %v3969_v57 = vpop.f32.mrb[184].mxu0  ;;  %4010 = vmatpush3.bf16.msra.mxu0 %v4143_v56 }
 0x89a   : > { %v2662_v37 = vadd.f32 %v3969_v57, %v5062_v51  ;;  %v2653_v8 = vpop.f32.mrb[185].mxu0 }
 0x89b   : > { %v2654_v28 = vadd.f32 %v5062_v51, %v2653_v8  ;;  %v3970_v18 = vpop.f32.mrb[186].mxu0 }
 0x89c   : > { %v2665_v61 = vadd.f32 %v3970_v18, %v5062_v51  ;;  %v2656_v39 = vpop.f32.mrb[187].mxu0  ;;  %v2710_v14 = vmax.f32 %v2662_v37, 0.0 }
 0x89d   : > { %v2657_v26 = vadd.f32 %v5062_v51, %v2656_v39  ;;  %v2708_v19 = vmax.f32 %v2654_v28, 0.0 }
 0x89e   : > { %v2711_v32 = vmax.f32 %v2665_v61, 0.0 }
 0x89f   : > { %v2709_v44 = vmax.f32 %v2657_v26, 0.0 }
 0x8a0   : > { %v4041_v20 = vpack.c.bf16 %v2711_v32, %v2710_v14 }
 0x8a1   : > { %v4037_v54 = vpack.c.bf16 %v2709_v44, %v2708_v19 }
 0x8a3   : > { %4038 = vmatprep.subr.bf16.mxu1 %v4037_v54 }
 0x8a4   : > { %4040 = vmatpush3.bf16.msra.mxu1 %v5088_v9 }
 0x8a5   : > { %4042 = vmatprep.subr.bf16.mxu1 %v4041_v20 }
 0x8a8   : > { %4044 = vmatpush3.bf16.msra.mxu1 %v5086_v53 }
 0x8a9   : > { %v3973_v31 = vpop.f32.mrb[188].mxu0 }
 0x8aa   : > { %v2678_v52 = vadd.f32 %v3973_v31, %v5062_v51  ;;  %v2669_v34 = vpop.f32.mrb[189].mxu0 }
 0x8ab   : > { %v2670_v60 = vadd.f32 %v5062_v51, %v2669_v34  ;;  %v3974_v23 = vpop.f32.mrb[190].mxu0 }
 0x8ac   : > { %v2681_v4 = vadd.f32 %v3974_v23, %v5062_v51  ;;  %v2672_v33 = vpop.f32.mrb[191].mxu0  ;;  %v2714_v43 = vmax.f32 %v2678_v52, 0.0 }
 0x8ad   : > { %v2673_v35 = vadd.f32 %v5062_v51, %v2672_v33  ;;  %v2712_v11 = vmax.f32 %v2670_v60, 0.0  ;;  %v548_v51 = vld [vmem:[%s5068_s19 + $0x10] sm:$0xff] }
 0x8ae   : > { %v2715_v9 = vmax.f32 %v2681_v4, 0.0 }
 0x8af   : > { %v2713_v55 = vmax.f32 %v2673_v35, 0.0 }
 0x8b0   : > { %v4049_v53 = vpack.c.bf16 %v2715_v9, %v2714_v43 }
 0x8b1   : > { %v4045_v40 = vpack.c.bf16 %v2713_v55, %v2712_v11 }
 0x8b3   : > { %4046 = vmatprep.subr.bf16.mxu1 %v4045_v40 }
 0x8b4   : > { %4048 = vmatpush3.bf16.msra.mxu1 %v5096_v1  ;;  %v4131_v1 = vld [vmem:[%s5209_s9 + $0x18] sm:$0xff]  }
 0x8b5   : > { %4050 = vmatprep.subr.bf16.mxu1 %v4049_v53 }
 0x8b8   : > { %4052 = vmatpush3.bf16.msra.mxu1 %v5094_v22  ;;  %v4130_v22 = vld [vmem:[%s5209_s9 + $0x10] sm:$0xff]  }
 0x8b9   : > { %3975 = vmatprep.subr.bf16.mxu1 %v4194_v46 }
 0x8bb   : > { %2781 = vmatmul.mubr.f32.vlgmr.msra.gmra.mrb[160].mxu1 %v546_v63 }
 0x8bc   : > { %2785 = vmatprep.mubr.f32.mxu1 %v549_v10  ;;  %3976 = vmatpush3.bf16.msra.mxu1 %v4128_v49 }
 0x8bd   : > { %3977 = vmatprep.subr.bf16.mxu1 %v4194_v46 }
 0x8bf   : > { %2786 = vmatmul.mubr.f32.gmra.mrb[162].mxu1 %v548_v51 }
 0x8c0   : > { %3978 = vmatpush3.bf16.msra.mxu1 %v4129_v29  ;;  %3991 = vmatprep.mubr.msk.bf16.mxu1 %vm4195_vm4, %v4194_v46 }
 0x8c1   : > { %3979 = vmatprep.subr.bf16.mxu1 %v4194_v46 }
 0x8c4   : > { %3980 = vmatpush3.bf16.msra.mxu1 %v4130_v22 }
 0x8c5   : > { %3981 = vmatprep.subr.bf16.mxu1 %v4194_v46 }
 0x8c8   : > { %3982 = vmatpush3.bf16.msra.mxu1 %v4131_v1 }
 0x8c9   : > { %3983 = vmatprep.subr.bf16.mxu1 %v4194_v46 }
 0x8cc   : > { %3984 = vmatpush3.bf16.msra.mxu1 %v4132_v27 }
 0x8cd   : > { %3985 = vmatprep.subr.bf16.mxu1 %v4194_v46 }
 0x8d0   : > { %3986 = vmatpush3.bf16.msra.mxu1 %v4133_v13 }
 0x8d1   : > { %3987 = vmatprep.subr.bf16.mxu1 %v4194_v46 }
 0x8d4   : > { %3988 = vmatpush3.bf16.msra.mxu1 %v4134_v36 }
 0x8d5   : > { %3989 = vmatprep.subr.bf16.mxu1 %v4194_v46  ;;  %v3194_v46 = vld [vmem:[%s5212_s12] ss:$0 sm:$0xff] }
 0x8d8   : > { %3990 = vmatpush3.bf16.msra.mxu1 %v4135_v21 }
 0x98e   : > { %v3707_v5 = vpop.f32.mrb[160].mxu1 }
 0x98f   : > { %v3708_v12 = vpop.f32.mrb[161].mxu1 }
 0x990   : > { %v3709_v15 = vadd.f32 %v3708_v12, %v3707_v5 }
 0x992   : > { %v3710_v17 = vpop.f32.mrb[162].mxu1 }
 0x993   : > { %v3711_v6 = vpop.f32.mrb[163].mxu1 }
 0x994   : > { %v3712_v2 = vadd.f32 %v3711_v6, %v3710_v17 }
 0x996   : > { %v2791_v25 = vpack.c.bf16 %v3712_v2, %v3709_v15 }
 0x998   : > { %3992 = vmatmul.mubr.bf16.vlgmr.msra.gmra.mrb[164].mxu1 %v2791_v25 }
 0xa6b   : > { %v2880_v59 = vpop.f32.mrb[164].mxu1 }
 0xa6c   : > { %v2881_v62 = vadd.f32 %v3185_v38, %v2880_v59  ;;  %v3993_v47 = vpop.f32.mrb[165].mxu1 }
 0xa6d   : > { %v2883_v50 = vpop.f32.mrb[166].mxu1 }
 0xa6e   : > { %v2884_v42 = vadd.f32 %v3185_v38, %v2883_v50  ;;  %v3994_v7 = vpop.f32.mrb[167].mxu1  ;;  %v2887_v0 = vmax.f32 %v2881_v62, 0.0 }
 0xa70   : > { %v2888_v3 = vmax.f32 %v2884_v42, 0.0 }
 0xa72   : > { %v2889_v57 = vpack.c.bf16 %v2888_v3, %v2887_v0 }
 0xa74   : > { %4012 = vmatmul.mubr.bf16.vlgmr.msra.gmra.mrb[192].mxu0 %v2889_v57 }
 0xb47   : > { %v2978_v37 = vpop.f32.mrb[192].mxu0 }
 0xb48   : > { %v2979_v8 = vadd.f32 %v3194_v46, %v2978_v37  ;;  %v4013_v28 = vpop.f32.mrb[193].mxu0 }
 0xb49   : > { %v2981_v18 = vpop.f32.mrb[194].mxu0 }
 0xb4a   : > { %2985 = vmax.xlane.f32.xlu0 %v2979_v8  ;;  %v4014_v61 = vpop.f32.mrb[195].mxu0  ;;  %v2982_v39 = vadd.f32 %v3194_v46, %v2981_v18 }
 0xb4e   : > { %2987 = vmax.xlane.f32.xlu0 %v2982_v39 }
 0xbd7   : > { %v2986_v26 = vpop.xlane.xlu0 %2985 }
 0xbd8   : > { %v2989_v14 = vsub.f32 %v2979_v8, %v2986_v26 }
 0xbda   : > { %v2991_v32 = vmul.f32 1.442695, %v2989_v14 }
 0xbdb   : > { %v2988_v19 = vpop.xlane.xlu0 %2987 }
 0xbdc   : > { %v2990_v44 = vsub.f32 %v2982_v39, %v2988_v19  ;;  %4144 = vpow2.f32 %v2991_v32 }
 0xbde   : > { %v2993_v20 = vmul.f32 1.442695, %v2990_v44 }
 0xbe0   : > { %4146 = vpow2.f32 %v2993_v20 }
 0xbe6   : > { %v4145_v54 = vpop.eup %4144 }
 0xbe7   : > { %2995 = vadd.xlane.f32.xlu1 %v4145_v54 }
 0xbea   : > { %v4147_v31 = vpop.eup %4146 }
 0xbeb   : > { %2997 = vadd.xlane.f32.xlu1 %v4147_v31 }
 0xc74   : > { %v2996_v52 = vpop.xlane.xlu1 %2995 }
 0xc75   : > { %4148 = vlog2.f32 %v2996_v52 }
 0xc78   : > { %v2998_v34 = vpop.xlane.xlu1 %2997 }
 0xc79   : > { %4150 = vlog2.f32 %v2998_v34 }
 0xc7f   : > { %v4149_v60 = vpop.eup %4148 }
 0xc80   : > { %v3000_v23 = vmul.f32 0.6931472, %v4149_v60 }
 0xc82   : > { %v3003_v4 = vadd.f32 %v3000_v23, %v2986_v26 }
 0xc83   : > { %v4151_v33 = vpop.eup %4150 }
 0xc84   : > { %v3005_v35 = vsub.f32 %v2979_v8, %v3003_v4  ;;  %v3002_v43 = vmul.f32 0.6931472, %v4151_v33 }
 0xc86   : > { %3007 = vst [vmem:[%s480_s14] sm:$0xff] %v3005_v35  ;;  %v3004_v9 = vadd.f32 %v3002_v43, %v2988_v19 }
 0xc88   : > { %v3006_v11 = vsub.f32 %v2982_v39, %v3004_v9 }
 0xc8a   : > { %3008 = vst [vmem:[%s480_s14 + $0x8] sm:$0xff] %v3006_v11 }
 0xc8b PF: > { %s23_s25 = sadd.s32 1, %s4191_s25  }
 0xc8c   : > { %p20_p4 = scmp.ge.s32.totalorder %s23_s25, 4  }
 0xc8e   :  { %22 = sbr.rel (!%p20_p4) target bundleno = 1 (0x1), region = 108 }

</bundles_post_ra>
